<compile_context>
chip_gen: v6e
topology: v6e:2x2x1
jax: 0.10.0
libtpu: 0.0.40
codegen_flags: <defaults>
</compile_context>

<pallas_src>
import functools
import numpy as np
import jax
import jax.numpy as jnp
from jax.experimental import pallas as pl
from jax.experimental.pallas import tpu as pltpu

LANE = 128


def _rup(n, m=LANE):
    return ((n + m - 1) // m) * m


# ----------------------------------------------------------------------------
# Fused kernel: 5 x (Conv1d(k,'same') + folded BN + tanh/identity), VMEM-resident
# ----------------------------------------------------------------------------
def _make_postnet_kernel(num_layers, T, K, tanh_flags, c_ins, c_outs):
    pad = (K - 1) // 2

    def kernel(*refs):
        x_ref = refs[0]                                   # (T, C0p) bf16
        w_refs = refs[1:1 + num_layers]                   # each (K, Cin_p, Cout_p) bf16
        sc_refs = refs[1 + num_layers:1 + 2 * num_layers] # each (1, Cout_p) f32
        sh_refs = refs[1 + 2 * num_layers:1 + 3 * num_layers]
        o_ref = refs[1 + 3 * num_layers]                  # (T, CLp) f32
        buf_a = refs[2 + 3 * num_layers]                  # (T + K - 1, Cmax) bf16
        buf_b = refs[3 + 3 * num_layers]

        cmax = buf_a.shape[1]
        halo = jnp.zeros((pad, cmax), buf_a.dtype)
        # Zero the K-1 halo rows once; layer writes only touch rows [pad, pad+T).
        buf_a[0:pad, :] = halo
        buf_a[pad + T:pad + T + pad, :] = halo
        buf_b[0:pad, :] = halo
        buf_b[pad + T:pad + T + pad, :] = halo

        # Stage the (lane-padded) input row into the ping buffer.
        buf_a[pad:pad + T, 0:c_ins[0]] = x_ref[...]

        bufs = (buf_a, buf_b)
        for li in range(num_layers):
            src = bufs[li % 2]
            dst = bufs[(li + 1) % 2]
            c_in, c_out = c_ins[li], c_outs[li]
            w = w_refs[li]
            # K sublane-shifted MXU matmuls; tap 0 initializes the accumulator.
            acc = jnp.dot(src[0:T, 0:c_in], w[0],
                          preferred_element_type=jnp.float32)
            for k in range(1, K):
                acc = acc + jnp.dot(src[k:k + T, 0:c_in], w[k],
                                    preferred_element_type=jnp.float32)
            y = acc * sc_refs[li][...] + sh_refs[li][...]
            if tanh_flags[li]:
                y = jnp.tanh(y)                           # EUP; free vs MXU slot
            if li == num_layers - 1:
                o_ref[...] = y.astype(o_ref.dtype)        # lane-dense (CLp=128k) store
            else:
                dst[pad:pad + T, 0:c_out] = y.astype(dst.dtype)

    return kernel


def postnet_pallas(params, x_ntc_padded):
    # x_ntc_padded: (B, T, C0p) bf16, channels already lane-padded.
    B, T, C0p = x_ntc_padded.shape
    layers = params["layers"]
    L = len(layers)
    K = layers[0]["w"].shape[0]
    pad = (K - 1) // 2
    Tp = T + 2 * pad
    c_ins = tuple(l["w"].shape[1] for l in layers)
    c_outs = tuple(l["w"].shape[2] for l in layers)
    cmax = max(max(c_ins), max(c_outs))
    CLp = c_outs[-1]
    tanh_flags = tuple(l["tanh"] for l in layers)

    weights = [l["w"] for l in layers]
    scales = [l["scale"] for l in layers]
    shifts = [l["shift"] for l in layers]

    kernel = _make_postnet_kernel(L, T, K, tanh_flags, c_ins, c_outs)

    in_specs = [pl.BlockSpec((None, T, C0p), lambda b: (b, 0, 0))]
    for w in weights:                                     # grid-invariant -> fetched once
        in_specs.append(pl.BlockSpec(w.shape, lambda b: (0, 0, 0)))
    for s in scales + shifts:
        in_specs.append(pl.BlockSpec(s.shape, lambda b: (0, 0)))

    flops = 2 * B * T * K * sum(ci * co for ci, co in zip(c_ins, c_outs))
    transc = B * T * sum(co for co, tf in zip(c_outs, tanh_flags) if tf)
    w_bytes = sum(int(w.size) * 2 for w in weights)
    ss_bytes = sum(int(s.size) * 4 for s in scales + shifts)
    bytes_accessed = B * T * C0p * 2 + w_bytes + ss_bytes + B * T * CLp * 4
    cost = pl.CostEstimate(flops=flops, transcendentals=transc,
                           bytes_accessed=bytes_accessed)

    # VMEM need: double-buffered I/O blocks + resident weights/affines (x2 safety
    # for pipeline buffering) + two ping-pong activation buffers. Capped well
    # below v7x's 64 MiB physical VMEM.
    need = (2 * (T * C0p * 2 + T * CLp * 4)
            + 2 * (w_bytes + ss_bytes)
            + 2 * Tp * cmax * 2)
    vmem_limit = int(min(2 * need + (8 << 20), 48 << 20))

    return pl.pallas_call(
        kernel,
        out_shape=jax.ShapeDtypeStruct((B, T, CLp), jnp.float32),
        grid=(B,),
        in_specs=in_specs,
        out_specs=pl.BlockSpec((None, T, CLp), lambda b: (b, 0, 0)),
        scratch_shapes=[pltpu.VMEM((Tp, cmax), jnp.bfloat16),
                        pltpu.VMEM((Tp, cmax), jnp.bfloat16)],
        compiler_params=pltpu.CompilerParams(
            dimension_semantics=("parallel",),            # batch rows -> megacore
            vmem_limit_bytes=vmem_limit),
        cost_estimate=cost,
    )(x_ntc_padded, *weights, *scales, *shifts)


# ----------------------------------------------------------------------------
# Parameter init (deterministic, synthetic) with BN folding + lane padding
# ----------------------------------------------------------------------------
def init_postnet_params(key, mel_dim, hidden, num_convs=5, kernel_size=5, eps=1e-5):
    chans = [mel_dim] + [hidden] * (num_convs - 1) + [mel_dim]
    keys = jax.random.split(key, num_convs * 6)
    ki = iter(range(num_convs * 6))
    layers = []
    for li in range(num_convs):
        c_in, c_out = chans[li], chans[li + 1]
        cip, cop = _rup(c_in), _rup(c_out)
        w = jax.random.normal(keys[next(ki)], (c_out, c_in, kernel_size), jnp.float32)
        w = w / np.sqrt(c_in * kernel_size)               # PyTorch-like fan-in scale
        bias = 0.1 * jax.random.normal(keys[next(ki)], (c_out,), jnp.float32)
        gamma = 1.0 + 0.1 * jax.random.normal(keys[next(ki)], (c_out,), jnp.float32)
        beta = 0.1 * jax.random.normal(keys[next(ki)], (c_out,), jnp.float32)
        mean = 0.1 * jax.random.normal(keys[next(ki)], (c_out,), jnp.float32)
        var = 1.0 + 0.1 * jnp.abs(jax.random.normal(keys[next(ki)], (c_out,), jnp.float32))
        scale = gamma / jnp.sqrt(var + eps)               # fold BN (eval, running stats)
        shift = scale * (bias - mean) + beta              # fold conv bias into shift
        w_kic = jnp.transpose(w, (2, 1, 0))               # (K, C_in, C_out)
        w_pad = jnp.zeros((kernel_size, cip, cop), jnp.float32)
        w_pad = w_pad.at[:, :c_in, :c_out].set(w_kic)     # zero-padded to lane multiples
        scale_pad = jnp.zeros((1, cop), jnp.float32).at[0, :c_out].set(scale)
        shift_pad = jnp.zeros((1, cop), jnp.float32).at[0, :c_out].set(shift)
        layers.append(dict(
            w=w_pad.astype(jnp.bfloat16),
            scale=scale_pad,
            shift=shift_pad,
            tanh=(li < num_convs - 1),                    # last layer: linear
        ))
    return dict(layers=layers, mel_dim=mel_dim)


# ----------------------------------------------------------------------------
# Forward wrapper (NCW in/out, NTC inside) and a pure-JAX reference
# ----------------------------------------------------------------------------
def postnet_forward(params, x_nct):
    # x_nct: (B, mel_dim, T) float32 (PyTorch NCW). Internally NTC, lane-padded.
    B, mel, T = x_nct.shape
    c0p = params["layers"][0]["w"].shape[1]
    h = jnp.transpose(x_nct.astype(jnp.bfloat16), (0, 2, 1))   # bf16 before transpose
    h = jnp.pad(h, ((0, 0), (0, 0), (0, c0p - mel)))           # mel -> 128 lanes
    out = postnet_pallas(params, h)                            # (B, T, CLp) f32
    out = out[:, :, :mel]
    return jnp.transpose(out, (0, 2, 1))                       # back to (B, mel, T)


def postnet_reference(params, x_nct):
    # Pure-JAX reference mirroring the kernel's numerics (bf16 weights,
    # bf16 inter-layer activations, f32 accumulation).
    layers = params["layers"]
    K = layers[0]["w"].shape[0]
    pad = (K - 1) // 2
    B, mel, T = x_nct.shape
    c0p = layers[0]["w"].shape[1]
    h = jnp.transpose(x_nct.astype(jnp.bfloat16).astype(jnp.float32), (0, 2, 1))
    h = jnp.pad(h, ((0, 0), (0, 0), (0, c0p - mel)))
    for li, l in enumerate(layers):
        w = l["w"].astype(jnp.float32)                         # (K, Cin_p, Cout_p)
        hp = jnp.pad(h, ((0, 0), (pad, pad), (0, 0)))
        acc = jnp.zeros((B, T, w.shape[2]), jnp.float32)
        for k in range(K):
            acc = acc + jnp.einsum("btc,cd->btd", hp[:, k:k + T, :], w[k])
        y = acc * l["scale"] + l["shift"]
        if l["tanh"]:
            y = jnp.tanh(y)
        if li == len(layers) - 1:
            h = y
        else:
            h = y.astype(jnp.bfloat16).astype(jnp.float32)
    return jnp.transpose(h[:, :, :mel], (0, 2, 1))


if __name__ == "__main__":
    B, mel_dim, T = 2, 16, 16
    hidden = 32                     # small stand-in for the real 512 channels
    K = 5

    key = jax.random.PRNGKey(0)
    k_par, k_x = jax.random.split(key)
    params = init_postnet_params(k_par, mel_dim, hidden, num_convs=5, kernel_size=K)

    x = jax.random.normal(k_x, (B, mel_dim, T), jnp.float32)
    out = jax.block_until_ready(postnet_forward(params, x))
    assert out.shape == (B, mel_dim, T)
    assert bool(jnp.all(jnp.isfinite(out)))

    ref = jax.block_until_ready(postnet_reference(params, x))
    err = float(jnp.max(jnp.abs(out - ref)))
    assert err < 5e-2, f"max abs err vs reference: {err}"
    print("KERNEL_OK")
</pallas_src>

<mosaic_0001>
module attributes {stable_mosaic.version = 11 : i64} {
  func.func @kernel(%arg0: i32, %arg1: memref<1x16x128xbf16, #tpu.memory_space<vmem>>, %arg2: memref<5x128x128xbf16, #tpu.memory_space<vmem>>, %arg3: memref<5x128x128xbf16, #tpu.memory_space<vmem>>, %arg4: memref<5x128x128xbf16, #tpu.memory_space<vmem>>, %arg5: memref<5x128x128xbf16, #tpu.memory_space<vmem>>, %arg6: memref<5x128x128xbf16, #tpu.memory_space<vmem>>, %arg7: memref<1x128xf32, #tpu.memory_space<vmem>>, %arg8: memref<1x128xf32, #tpu.memory_space<vmem>>, %arg9: memref<1x128xf32, #tpu.memory_space<vmem>>, %arg10: memref<1x128xf32, #tpu.memory_space<vmem>>, %arg11: memref<1x128xf32, #tpu.memory_space<vmem>>, %arg12: memref<1x128xf32, #tpu.memory_space<vmem>>, %arg13: memref<1x128xf32, #tpu.memory_space<vmem>>, %arg14: memref<1x128xf32, #tpu.memory_space<vmem>>, %arg15: memref<1x128xf32, #tpu.memory_space<vmem>>, %arg16: memref<1x128xf32, #tpu.memory_space<vmem>>, %arg17: memref<1x16x128xf32, #tpu.memory_space<vmem>>, %arg18: memref<20x128xbf16, #tpu.memory_space<vmem>>, %arg19: memref<20x128xbf16, #tpu.memory_space<vmem>>) attributes {dimension_semantics = [#tpu.dimension_semantics<parallel>], iteration_bounds = array<i64: 2>, scalar_prefetch = 0 : i64, scratch_operands = 2 : i64, tpu.core_type = #tpu.core_type<tc>, window_params = [{transform_indices = @transform_0, window_bounds = array<i64: 1, 16, 128>}, {pipeline_mode = #tpu.pipeline_mode<synchronous>, transform_indices = @transform_1, window_bounds = array<i64: 5, 128, 128>}, {pipeline_mode = #tpu.pipeline_mode<synchronous>, transform_indices = @transform_2, window_bounds = array<i64: 5, 128, 128>}, {pipeline_mode = #tpu.pipeline_mode<synchronous>, transform_indices = @transform_3, window_bounds = array<i64: 5, 128, 128>}, {pipeline_mode = #tpu.pipeline_mode<synchronous>, transform_indices = @transform_4, window_bounds = array<i64: 5, 128, 128>}, {pipeline_mode = #tpu.pipeline_mode<synchronous>, transform_indices = @transform_5, window_bounds = array<i64: 5, 128, 128>}, {pipeline_mode = #tpu.pipeline_mode<synchronous>, transform_indices = @transform_6, window_bounds = array<i64: 1, 128>}, {pipeline_mode = #tpu.pipeline_mode<synchronous>, transform_indices = @transform_7, window_bounds = array<i64: 1, 128>}, {pipeline_mode = #tpu.pipeline_mode<synchronous>, transform_indices = @transform_8, window_bounds = array<i64: 1, 128>}, {pipeline_mode = #tpu.pipeline_mode<synchronous>, transform_indices = @transform_9, window_bounds = array<i64: 1, 128>}, {pipeline_mode = #tpu.pipeline_mode<synchronous>, transform_indices = @transform_10, window_bounds = array<i64: 1, 128>}, {pipeline_mode = #tpu.pipeline_mode<synchronous>, transform_indices = @transform_11, window_bounds = array<i64: 1, 128>}, {pipeline_mode = #tpu.pipeline_mode<synchronous>, transform_indices = @transform_12, window_bounds = array<i64: 1, 128>}, {pipeline_mode = #tpu.pipeline_mode<synchronous>, transform_indices = @transform_13, window_bounds = array<i64: 1, 128>}, {pipeline_mode = #tpu.pipeline_mode<synchronous>, transform_indices = @transform_14, window_bounds = array<i64: 1, 128>}, {pipeline_mode = #tpu.pipeline_mode<synchronous>, transform_indices = @transform_15, window_bounds = array<i64: 1, 128>}, {transform_indices = @transform_16, window_bounds = array<i64: 1, 16, 128>}]} {
    %cst = arith.constant 0.000000e+00 : bf16
    %0 = vector.broadcast %cst : bf16 to vector<2x128xbf16>
    %c0 = arith.constant 0 : index
    %c0_0 = arith.constant 0 : index
    %1 = vector.load %arg18[%c0, %c0_0] : memref<20x128xbf16, #tpu.memory_space<vmem>>, vector<2x128xbf16>
    tpu.vector_store %arg18[%c0, %c0_0], %0 {strides = array<i32>} : memref<20x128xbf16, #tpu.memory_space<vmem>>, vector<2x128xbf16>,
    %c18 = arith.constant 18 : index
    %c0_1 = arith.constant 0 : index
    %2 = vector.load %arg18[%c18, %c0_1] : memref<20x128xbf16, #tpu.memory_space<vmem>>, vector<2x128xbf16>
    tpu.vector_store %arg18[%c18, %c0_1], %0 {strides = array<i32>} : memref<20x128xbf16, #tpu.memory_space<vmem>>, vector<2x128xbf16>,
    %c0_2 = arith.constant 0 : index
    %c0_3 = arith.constant 0 : index
    %3 = vector.load %arg19[%c0_2, %c0_3] : memref<20x128xbf16, #tpu.memory_space<vmem>>, vector<2x128xbf16>
    tpu.vector_store %arg19[%c0_2, %c0_3], %0 {strides = array<i32>} : memref<20x128xbf16, #tpu.memory_space<vmem>>, vector<2x128xbf16>,
    %c18_4 = arith.constant 18 : index
    %c0_5 = arith.constant 0 : index
    %4 = vector.load %arg19[%c18_4, %c0_5] : memref<20x128xbf16, #tpu.memory_space<vmem>>, vector<2x128xbf16>
    tpu.vector_store %arg19[%c18_4, %c0_5], %0 {strides = array<i32>} : memref<20x128xbf16, #tpu.memory_space<vmem>>, vector<2x128xbf16>,
    %c0_6 = arith.constant 0 : index
    %c0_7 = arith.constant 0 : index
    %c0_8 = arith.constant 0 : index
    %5 = vector.load %arg1[%c0_6, %c0_7, %c0_8] : memref<1x16x128xbf16, #tpu.memory_space<vmem>>, vector<1x16x128xbf16>
    %6 = vector.shape_cast %5 : vector<1x16x128xbf16> to vector<16x128xbf16>
    %c2 = arith.constant 2 : index
    %c0_9 = arith.constant 0 : index
    %7 = vector.load %arg18[%c2, %c0_9] : memref<20x128xbf16, #tpu.memory_space<vmem>>, vector<16x128xbf16>
    tpu.vector_store %arg18[%c2, %c0_9], %6 {strides = array<i32>} : memref<20x128xbf16, #tpu.memory_space<vmem>>, vector<16x128xbf16>,
    %c0_10 = arith.constant 0 : index
    %c0_11 = arith.constant 0 : index
    %8 = vector.load %arg18[%c0_10, %c0_11] : memref<20x128xbf16, #tpu.memory_space<vmem>>, vector<16x128xbf16>
    %c0_12 = arith.constant 0 : index
    %c0_13 = arith.constant 0 : index
    %c0_14 = arith.constant 0 : index
    %9 = vector.load %arg2[%c0_12, %c0_13, %c0_14] : memref<5x128x128xbf16, #tpu.memory_space<vmem>>, vector<1x128x128xbf16>
    %10 = vector.shape_cast %9 : vector<1x128x128xbf16> to vector<128x128xbf16>
    %cst_15 = arith.constant dense<0.000000e+00> : vector<16x128xf32>
    %11 = tpu.matmul %8, %10, %cst_15 {dimension_numbers = #tpu.dot_dimension_numbers<[1], [0], [0], [1], [0, 0, 1, 1], [], []>} : vector<16x128xbf16>, vector<128x128xbf16>, vector<16x128xf32> -> vector<16x128xf32>
    %c1 = arith.constant 1 : index
    %c0_16 = arith.constant 0 : index
    %12 = vector.load %arg18[%c1, %c0_16] : memref<20x128xbf16, #tpu.memory_space<vmem>>, vector<16x128xbf16>
    %c1_17 = arith.constant 1 : index
    %c0_18 = arith.constant 0 : index
    %c0_19 = arith.constant 0 : index
    %13 = vector.load %arg2[%c1_17, %c0_18, %c0_19] : memref<5x128x128xbf16, #tpu.memory_space<vmem>>, vector<1x128x128xbf16>
    %14 = vector.shape_cast %13 : vector<1x128x128xbf16> to vector<128x128xbf16>
    %cst_20 = arith.constant dense<0.000000e+00> : vector<16x128xf32>
    %15 = tpu.matmul %12, %14, %cst_20 {dimension_numbers = #tpu.dot_dimension_numbers<[1], [0], [0], [1], [0, 0, 1, 1], [], []>} : vector<16x128xbf16>, vector<128x128xbf16>, vector<16x128xf32> -> vector<16x128xf32>
    %16 = arith.addf %11, %15 : vector<16x128xf32>
    %c2_21 = arith.constant 2 : index
    %c0_22 = arith.constant 0 : index
    %17 = vector.load %arg18[%c2_21, %c0_22] : memref<20x128xbf16, #tpu.memory_space<vmem>>, vector<16x128xbf16>
    %c2_23 = arith.constant 2 : index
    %c0_24 = arith.constant 0 : index
    %c0_25 = arith.constant 0 : index
    %18 = vector.load %arg2[%c2_23, %c0_24, %c0_25] : memref<5x128x128xbf16, #tpu.memory_space<vmem>>, vector<1x128x128xbf16>
    %19 = vector.shape_cast %18 : vector<1x128x128xbf16> to vector<128x128xbf16>
    %cst_26 = arith.constant dense<0.000000e+00> : vector<16x128xf32>
    %20 = tpu.matmul %17, %19, %cst_26 {dimension_numbers = #tpu.dot_dimension_numbers<[1], [0], [0], [1], [0, 0, 1, 1], [], []>} : vector<16x128xbf16>, vector<128x128xbf16>, vector<16x128xf32> -> vector<16x128xf32>
    %21 = arith.addf %16, %20 : vector<16x128xf32>
    %c3 = arith.constant 3 : index
    %c0_27 = arith.constant 0 : index
    %22 = vector.load %arg18[%c3, %c0_27] : memref<20x128xbf16, #tpu.memory_space<vmem>>, vector<16x128xbf16>
    %c3_28 = arith.constant 3 : index
    %c0_29 = arith.constant 0 : index
    %c0_30 = arith.constant 0 : index
    %23 = vector.load %arg2[%c3_28, %c0_29, %c0_30] : memref<5x128x128xbf16, #tpu.memory_space<vmem>>, vector<1x128x128xbf16>
    %24 = vector.shape_cast %23 : vector<1x128x128xbf16> to vector<128x128xbf16>
    %cst_31 = arith.constant dense<0.000000e+00> : vector<16x128xf32>
    %25 = tpu.matmul %22, %24, %cst_31 {dimension_numbers = #tpu.dot_dimension_numbers<[1], [0], [0], [1], [0, 0, 1, 1], [], []>} : vector<16x128xbf16>, vector<128x128xbf16>, vector<16x128xf32> -> vector<16x128xf32>
    %26 = arith.addf %21, %25 : vector<16x128xf32>
    %c4 = arith.constant 4 : index
    %c0_32 = arith.constant 0 : index
    %27 = vector.load %arg18[%c4, %c0_32] : memref<20x128xbf16, #tpu.memory_space<vmem>>, vector<16x128xbf16>
    %c4_33 = arith.constant 4 : index
    %c0_34 = arith.constant 0 : index
    %c0_35 = arith.constant 0 : index
    %28 = vector.load %arg2[%c4_33, %c0_34, %c0_35] : memref<5x128x128xbf16, #tpu.memory_space<vmem>>, vector<1x128x128xbf16>
    %29 = vector.shape_cast %28 : vector<1x128x128xbf16> to vector<128x128xbf16>
    %cst_36 = arith.constant dense<0.000000e+00> : vector<16x128xf32>
    %30 = tpu.matmul %27, %29, %cst_36 {dimension_numbers = #tpu.dot_dimension_numbers<[1], [0], [0], [1], [0, 0, 1, 1], [], []>} : vector<16x128xbf16>, vector<128x128xbf16>, vector<16x128xf32> -> vector<16x128xf32>
    %31 = arith.addf %26, %30 : vector<16x128xf32>
    %c0_37 = arith.constant 0 : index
    %c0_38 = arith.constant 0 : index
    %32 = vector.load %arg7[%c0_37, %c0_38] : memref<1x128xf32, #tpu.memory_space<vmem>>, vector<1x128xf32>
    %33 = vector.broadcast %32 : vector<1x128xf32> to vector<16x128xf32>
    %34 = arith.mulf %31, %33 : vector<16x128xf32>
    %c0_39 = arith.constant 0 : index
    %c0_40 = arith.constant 0 : index
    %35 = vector.load %arg12[%c0_39, %c0_40] : memref<1x128xf32, #tpu.memory_space<vmem>>, vector<1x128xf32>
    %36 = vector.broadcast %35 : vector<1x128xf32> to vector<16x128xf32>
    %37 = arith.addf %34, %36 : vector<16x128xf32>
    %38 = math.tanh %37 : vector<16x128xf32>
    %39 = arith.truncf %38 : vector<16x128xf32> to vector<16x128xbf16>
    %c2_41 = arith.constant 2 : index
    %c0_42 = arith.constant 0 : index
    %40 = vector.load %arg19[%c2_41, %c0_42] : memref<20x128xbf16, #tpu.memory_space<vmem>>, vector<16x128xbf16>
    tpu.vector_store %arg19[%c2_41, %c0_42], %39 {strides = array<i32>} : memref<20x128xbf16, #tpu.memory_space<vmem>>, vector<16x128xbf16>,
    %c0_43 = arith.constant 0 : index
    %c0_44 = arith.constant 0 : index
    %41 = vector.load %arg19[%c0_43, %c0_44] : memref<20x128xbf16, #tpu.memory_space<vmem>>, vector<16x128xbf16>
    %c0_45 = arith.constant 0 : index
    %c0_46 = arith.constant 0 : index
    %c0_47 = arith.constant 0 : index
    %42 = vector.load %arg3[%c0_45, %c0_46, %c0_47] : memref<5x128x128xbf16, #tpu.memory_space<vmem>>, vector<1x128x128xbf16>
    %43 = vector.shape_cast %42 : vector<1x128x128xbf16> to vector<128x128xbf16>
    %cst_48 = arith.constant dense<0.000000e+00> : vector<16x128xf32>
    %44 = tpu.matmul %41, %43, %cst_48 {dimension_numbers = #tpu.dot_dimension_numbers<[1], [0], [0], [1], [0, 0, 1, 1], [], []>} : vector<16x128xbf16>, vector<128x128xbf16>, vector<16x128xf32> -> vector<16x128xf32>
    %c1_49 = arith.constant 1 : index
    %c0_50 = arith.constant 0 : index
    %45 = vector.load %arg19[%c1_49, %c0_50] : memref<20x128xbf16, #tpu.memory_space<vmem>>, vector<16x128xbf16>
    %c1_51 = arith.constant 1 : index
    %c0_52 = arith.constant 0 : index
    %c0_53 = arith.constant 0 : index
    %46 = vector.load %arg3[%c1_51, %c0_52, %c0_53] : memref<5x128x128xbf16, #tpu.memory_space<vmem>>, vector<1x128x128xbf16>
    %47 = vector.shape_cast %46 : vector<1x128x128xbf16> to vector<128x128xbf16>
    %cst_54 = arith.constant dense<0.000000e+00> : vector<16x128xf32>
    %48 = tpu.matmul %45, %47, %cst_54 {dimension_numbers = #tpu.dot_dimension_numbers<[1], [0], [0], [1], [0, 0, 1, 1], [], []>} : vector<16x128xbf16>, vector<128x128xbf16>, vector<16x128xf32> -> vector<16x128xf32>
    %49 = arith.addf %44, %48 : vector<16x128xf32>
    %c2_55 = arith.constant 2 : index
    %c0_56 = arith.constant 0 : index
    %50 = vector.load %arg19[%c2_55, %c0_56] : memref<20x128xbf16, #tpu.memory_space<vmem>>, vector<16x128xbf16>
    %c2_57 = arith.constant 2 : index
    %c0_58 = arith.constant 0 : index
    %c0_59 = arith.constant 0 : index
    %51 = vector.load %arg3[%c2_57, %c0_58, %c0_59] : memref<5x128x128xbf16, #tpu.memory_space<vmem>>, vector<1x128x128xbf16>
    %52 = vector.shape_cast %51 : vector<1x128x128xbf16> to vector<128x128xbf16>
    %cst_60 = arith.constant dense<0.000000e+00> : vector<16x128xf32>
    %53 = tpu.matmul %50, %52, %cst_60 {dimension_numbers = #tpu.dot_dimension_numbers<[1], [0], [0], [1], [0, 0, 1, 1], [], []>} : vector<16x128xbf16>, vector<128x128xbf16>, vector<16x128xf32> -> vector<16x128xf32>
    %54 = arith.addf %49, %53 : vector<16x128xf32>
    %c3_61 = arith.constant 3 : index
    %c0_62 = arith.constant 0 : index
    %55 = vector.load %arg19[%c3_61, %c0_62] : memref<20x128xbf16, #tpu.memory_space<vmem>>, vector<16x128xbf16>
    %c3_63 = arith.constant 3 : index
    %c0_64 = arith.constant 0 : index
    %c0_65 = arith.constant 0 : index
    %56 = vector.load %arg3[%c3_63, %c0_64, %c0_65] : memref<5x128x128xbf16, #tpu.memory_space<vmem>>, vector<1x128x128xbf16>
    %57 = vector.shape_cast %56 : vector<1x128x128xbf16> to vector<128x128xbf16>
    %cst_66 = arith.constant dense<0.000000e+00> : vector<16x128xf32>
    %58 = tpu.matmul %55, %57, %cst_66 {dimension_numbers = #tpu.dot_dimension_numbers<[1], [0], [0], [1], [0, 0, 1, 1], [], []>} : vector<16x128xbf16>, vector<128x128xbf16>, vector<16x128xf32> -> vector<16x128xf32>
    %59 = arith.addf %54, %58 : vector<16x128xf32>
    %c4_67 = arith.constant 4 : index
    %c0_68 = arith.constant 0 : index
    %60 = vector.load %arg19[%c4_67, %c0_68] : memref<20x128xbf16, #tpu.memory_space<vmem>>, vector<16x128xbf16>
    %c4_69 = arith.constant 4 : index
    %c0_70 = arith.constant 0 : index
    %c0_71 = arith.constant 0 : index
    %61 = vector.load %arg3[%c4_69, %c0_70, %c0_71] : memref<5x128x128xbf16, #tpu.memory_space<vmem>>, vector<1x128x128xbf16>
    %62 = vector.shape_cast %61 : vector<1x128x128xbf16> to vector<128x128xbf16>
    %cst_72 = arith.constant dense<0.000000e+00> : vector<16x128xf32>
    %63 = tpu.matmul %60, %62, %cst_72 {dimension_numbers = #tpu.dot_dimension_numbers<[1], [0], [0], [1], [0, 0, 1, 1], [], []>} : vector<16x128xbf16>, vector<128x128xbf16>, vector<16x128xf32> -> vector<16x128xf32>
    %64 = arith.addf %59, %63 : vector<16x128xf32>
    %c0_73 = arith.constant 0 : index
    %c0_74 = arith.constant 0 : index
    %65 = vector.load %arg8[%c0_73, %c0_74] : memref<1x128xf32, #tpu.memory_space<vmem>>, vector<1x128xf32>
    %66 = vector.broadcast %65 : vector<1x128xf32> to vector<16x128xf32>
    %67 = arith.mulf %64, %66 : vector<16x128xf32>
    %c0_75 = arith.constant 0 : index
    %c0_76 = arith.constant 0 : index
    %68 = vector.load %arg13[%c0_75, %c0_76] : memref<1x128xf32, #tpu.memory_space<vmem>>, vector<1x128xf32>
    %69 = vector.broadcast %68 : vector<1x128xf32> to vector<16x128xf32>
    %70 = arith.addf %67, %69 : vector<16x128xf32>
    %71 = math.tanh %70 : vector<16x128xf32>
    %72 = arith.truncf %71 : vector<16x128xf32> to vector<16x128xbf16>
    %c2_77 = arith.constant 2 : index
    %c0_78 = arith.constant 0 : index
    %73 = vector.load %arg18[%c2_77, %c0_78] : memref<20x128xbf16, #tpu.memory_space<vmem>>, vector<16x128xbf16>
    tpu.vector_store %arg18[%c2_77, %c0_78], %72 {strides = array<i32>} : memref<20x128xbf16, #tpu.memory_space<vmem>>, vector<16x128xbf16>,
    %c0_79 = arith.constant 0 : index
    %c0_80 = arith.constant 0 : index
    %74 = vector.load %arg18[%c0_79, %c0_80] : memref<20x128xbf16, #tpu.memory_space<vmem>>, vector<16x128xbf16>
    %c0_81 = arith.constant 0 : index
    %c0_82 = arith.constant 0 : index
    %c0_83 = arith.constant 0 : index
    %75 = vector.load %arg4[%c0_81, %c0_82, %c0_83] : memref<5x128x128xbf16, #tpu.memory_space<vmem>>, vector<1x128x128xbf16>
    %76 = vector.shape_cast %75 : vector<1x128x128xbf16> to vector<128x128xbf16>
    %cst_84 = arith.constant dense<0.000000e+00> : vector<16x128xf32>
    %77 = tpu.matmul %74, %76, %cst_84 {dimension_numbers = #tpu.dot_dimension_numbers<[1], [0], [0], [1], [0, 0, 1, 1], [], []>} : vector<16x128xbf16>, vector<128x128xbf16>, vector<16x128xf32> -> vector<16x128xf32>
    %c1_85 = arith.constant 1 : index
    %c0_86 = arith.constant 0 : index
    %78 = vector.load %arg18[%c1_85, %c0_86] : memref<20x128xbf16, #tpu.memory_space<vmem>>, vector<16x128xbf16>
    %c1_87 = arith.constant 1 : index
    %c0_88 = arith.constant 0 : index
    %c0_89 = arith.constant 0 : index
    %79 = vector.load %arg4[%c1_87, %c0_88, %c0_89] : memref<5x128x128xbf16, #tpu.memory_space<vmem>>, vector<1x128x128xbf16>
    %80 = vector.shape_cast %79 : vector<1x128x128xbf16> to vector<128x128xbf16>
    %cst_90 = arith.constant dense<0.000000e+00> : vector<16x128xf32>
    %81 = tpu.matmul %78, %80, %cst_90 {dimension_numbers = #tpu.dot_dimension_numbers<[1], [0], [0], [1], [0, 0, 1, 1], [], []>} : vector<16x128xbf16>, vector<128x128xbf16>, vector<16x128xf32> -> vector<16x128xf32>
    %82 = arith.addf %77, %81 : vector<16x128xf32>
    %c2_91 = arith.constant 2 : index
    %c0_92 = arith.constant 0 : index
    %83 = vector.load %arg18[%c2_91, %c0_92] : memref<20x128xbf16, #tpu.memory_space<vmem>>, vector<16x128xbf16>
    %c2_93 = arith.constant 2 : index
    %c0_94 = arith.constant 0 : index
    %c0_95 = arith.constant 0 : index
    %84 = vector.load %arg4[%c2_93, %c0_94, %c0_95] : memref<5x128x128xbf16, #tpu.memory_space<vmem>>, vector<1x128x128xbf16>
    %85 = vector.shape_cast %84 : vector<1x128x128xbf16> to vector<128x128xbf16>
    %cst_96 = arith.constant dense<0.000000e+00> : vector<16x128xf32>
    %86 = tpu.matmul %83, %85, %cst_96 {dimension_numbers = #tpu.dot_dimension_numbers<[1], [0], [0], [1], [0, 0, 1, 1], [], []>} : vector<16x128xbf16>, vector<128x128xbf16>, vector<16x128xf32> -> vector<16x128xf32>
    %87 = arith.addf %82, %86 : vector<16x128xf32>
    %c3_97 = arith.constant 3 : index
    %c0_98 = arith.constant 0 : index
    %88 = vector.load %arg18[%c3_97, %c0_98] : memref<20x128xbf16, #tpu.memory_space<vmem>>, vector<16x128xbf16>
    %c3_99 = arith.constant 3 : index
    %c0_100 = arith.constant 0 : index
    %c0_101 = arith.constant 0 : index
    %89 = vector.load %arg4[%c3_99, %c0_100, %c0_101] : memref<5x128x128xbf16, #tpu.memory_space<vmem>>, vector<1x128x128xbf16>
    %90 = vector.shape_cast %89 : vector<1x128x128xbf16> to vector<128x128xbf16>
    %cst_102 = arith.constant dense<0.000000e+00> : vector<16x128xf32>
    %91 = tpu.matmul %88, %90, %cst_102 {dimension_numbers = #tpu.dot_dimension_numbers<[1], [0], [0], [1], [0, 0, 1, 1], [], []>} : vector<16x128xbf16>, vector<128x128xbf16>, vector<16x128xf32> -> vector<16x128xf32>
    %92 = arith.addf %87, %91 : vector<16x128xf32>
    %c4_103 = arith.constant 4 : index
    %c0_104 = arith.constant 0 : index
    %93 = vector.load %arg18[%c4_103, %c0_104] : memref<20x128xbf16, #tpu.memory_space<vmem>>, vector<16x128xbf16>
    %c4_105 = arith.constant 4 : index
    %c0_106 = arith.constant 0 : index
    %c0_107 = arith.constant 0 : index
    %94 = vector.load %arg4[%c4_105, %c0_106, %c0_107] : memref<5x128x128xbf16, #tpu.memory_space<vmem>>, vector<1x128x128xbf16>
    %95 = vector.shape_cast %94 : vector<1x128x128xbf16> to vector<128x128xbf16>
    %cst_108 = arith.constant dense<0.000000e+00> : vector<16x128xf32>
    %96 = tpu.matmul %93, %95, %cst_108 {dimension_numbers = #tpu.dot_dimension_numbers<[1], [0], [0], [1], [0, 0, 1, 1], [], []>} : vector<16x128xbf16>, vector<128x128xbf16>, vector<16x128xf32> -> vector<16x128xf32>
    %97 = arith.addf %92, %96 : vector<16x128xf32>
    %c0_109 = arith.constant 0 : index
    %c0_110 = arith.constant 0 : index
    %98 = vector.load %arg9[%c0_109, %c0_110] : memref<1x128xf32, #tpu.memory_space<vmem>>, vector<1x128xf32>
    %99 = vector.broadcast %98 : vector<1x128xf32> to vector<16x128xf32>
    %100 = arith.mulf %97, %99 : vector<16x128xf32>
    %c0_111 = arith.constant 0 : index
    %c0_112 = arith.constant 0 : index
    %101 = vector.load %arg14[%c0_111, %c0_112] : memref<1x128xf32, #tpu.memory_space<vmem>>, vector<1x128xf32>
    %102 = vector.broadcast %101 : vector<1x128xf32> to vector<16x128xf32>
    %103 = arith.addf %100, %102 : vector<16x128xf32>
    %104 = math.tanh %103 : vector<16x128xf32>
    %105 = arith.truncf %104 : vector<16x128xf32> to vector<16x128xbf16>
    %c2_113 = arith.constant 2 : index
    %c0_114 = arith.constant 0 : index
    %106 = vector.load %arg19[%c2_113, %c0_114] : memref<20x128xbf16, #tpu.memory_space<vmem>>, vector<16x128xbf16>
    tpu.vector_store %arg19[%c2_113, %c0_114], %105 {strides = array<i32>} : memref<20x128xbf16, #tpu.memory_space<vmem>>, vector<16x128xbf16>,
    %c0_115 = arith.constant 0 : index
    %c0_116 = arith.constant 0 : index
    %107 = vector.load %arg19[%c0_115, %c0_116] : memref<20x128xbf16, #tpu.memory_space<vmem>>, vector<16x128xbf16>
    %c0_117 = arith.constant 0 : index
    %c0_118 = arith.constant 0 : index
    %c0_119 = arith.constant 0 : index
    %108 = vector.load %arg5[%c0_117, %c0_118, %c0_119] : memref<5x128x128xbf16, #tpu.memory_space<vmem>>, vector<1x128x128xbf16>
    %109 = vector.shape_cast %108 : vector<1x128x128xbf16> to vector<128x128xbf16>
    %cst_120 = arith.constant dense<0.000000e+00> : vector<16x128xf32>
    %110 = tpu.matmul %107, %109, %cst_120 {dimension_numbers = #tpu.dot_dimension_numbers<[1], [0], [0], [1], [0, 0, 1, 1], [], []>} : vector<16x128xbf16>, vector<128x128xbf16>, vector<16x128xf32> -> vector<16x128xf32>
    %c1_121 = arith.constant 1 : index
    %c0_122 = arith.constant 0 : index
    %111 = vector.load %arg19[%c1_121, %c0_122] : memref<20x128xbf16, #tpu.memory_space<vmem>>, vector<16x128xbf16>
    %c1_123 = arith.constant 1 : index
    %c0_124 = arith.constant 0 : index
    %c0_125 = arith.constant 0 : index
    %112 = vector.load %arg5[%c1_123, %c0_124, %c0_125] : memref<5x128x128xbf16, #tpu.memory_space<vmem>>, vector<1x128x128xbf16>
    %113 = vector.shape_cast %112 : vector<1x128x128xbf16> to vector<128x128xbf16>
    %cst_126 = arith.constant dense<0.000000e+00> : vector<16x128xf32>
    %114 = tpu.matmul %111, %113, %cst_126 {dimension_numbers = #tpu.dot_dimension_numbers<[1], [0], [0], [1], [0, 0, 1, 1], [], []>} : vector<16x128xbf16>, vector<128x128xbf16>, vector<16x128xf32> -> vector<16x128xf32>
    %115 = arith.addf %110, %114 : vector<16x128xf32>
    %c2_127 = arith.constant 2 : index
    %c0_128 = arith.constant 0 : index
    %116 = vector.load %arg19[%c2_127, %c0_128] : memref<20x128xbf16, #tpu.memory_space<vmem>>, vector<16x128xbf16>
    %c2_129 = arith.constant 2 : index
    %c0_130 = arith.constant 0 : index
    %c0_131 = arith.constant 0 : index
    %117 = vector.load %arg5[%c2_129, %c0_130, %c0_131] : memref<5x128x128xbf16, #tpu.memory_space<vmem>>, vector<1x128x128xbf16>
    %118 = vector.shape_cast %117 : vector<1x128x128xbf16> to vector<128x128xbf16>
    %cst_132 = arith.constant dense<0.000000e+00> : vector<16x128xf32>
    %119 = tpu.matmul %116, %118, %cst_132 {dimension_numbers = #tpu.dot_dimension_numbers<[1], [0], [0], [1], [0, 0, 1, 1], [], []>} : vector<16x128xbf16>, vector<128x128xbf16>, vector<16x128xf32> -> vector<16x128xf32>
    %120 = arith.addf %115, %119 : vector<16x128xf32>
    %c3_133 = arith.constant 3 : index
    %c0_134 = arith.constant 0 : index
    %121 = vector.load %arg19[%c3_133, %c0_134] : memref<20x128xbf16, #tpu.memory_space<vmem>>, vector<16x128xbf16>
    %c3_135 = arith.constant 3 : index
    %c0_136 = arith.constant 0 : index
    %c0_137 = arith.constant 0 : index
    %122 = vector.load %arg5[%c3_135, %c0_136, %c0_137] : memref<5x128x128xbf16, #tpu.memory_space<vmem>>, vector<1x128x128xbf16>
    %123 = vector.shape_cast %122 : vector<1x128x128xbf16> to vector<128x128xbf16>
    %cst_138 = arith.constant dense<0.000000e+00> : vector<16x128xf32>
    %124 = tpu.matmul %121, %123, %cst_138 {dimension_numbers = #tpu.dot_dimension_numbers<[1], [0], [0], [1], [0, 0, 1, 1], [], []>} : vector<16x128xbf16>, vector<128x128xbf16>, vector<16x128xf32> -> vector<16x128xf32>
    %125 = arith.addf %120, %124 : vector<16x128xf32>
    %c4_139 = arith.constant 4 : index
    %c0_140 = arith.constant 0 : index
    %126 = vector.load %arg19[%c4_139, %c0_140] : memref<20x128xbf16, #tpu.memory_space<vmem>>, vector<16x128xbf16>
    %c4_141 = arith.constant 4 : index
    %c0_142 = arith.constant 0 : index
    %c0_143 = arith.constant 0 : index
    %127 = vector.load %arg5[%c4_141, %c0_142, %c0_143] : memref<5x128x128xbf16, #tpu.memory_space<vmem>>, vector<1x128x128xbf16>
    %128 = vector.shape_cast %127 : vector<1x128x128xbf16> to vector<128x128xbf16>
    %cst_144 = arith.constant dense<0.000000e+00> : vector<16x128xf32>
    %129 = tpu.matmul %126, %128, %cst_144 {dimension_numbers = #tpu.dot_dimension_numbers<[1], [0], [0], [1], [0, 0, 1, 1], [], []>} : vector<16x128xbf16>, vector<128x128xbf16>, vector<16x128xf32> -> vector<16x128xf32>
    %130 = arith.addf %125, %129 : vector<16x128xf32>
    %c0_145 = arith.constant 0 : index
    %c0_146 = arith.constant 0 : index
    %131 = vector.load %arg10[%c0_145, %c0_146] : memref<1x128xf32, #tpu.memory_space<vmem>>, vector<1x128xf32>
    %132 = vector.broadcast %131 : vector<1x128xf32> to vector<16x128xf32>
    %133 = arith.mulf %130, %132 : vector<16x128xf32>
    %c0_147 = arith.constant 0 : index
    %c0_148 = arith.constant 0 : index
    %134 = vector.load %arg15[%c0_147, %c0_148] : memref<1x128xf32, #tpu.memory_space<vmem>>, vector<1x128xf32>
    %135 = vector.broadcast %134 : vector<1x128xf32> to vector<16x128xf32>
    %136 = arith.addf %133, %135 : vector<16x128xf32>
    %137 = math.tanh %136 : vector<16x128xf32>
    %138 = arith.truncf %137 : vector<16x128xf32> to vector<16x128xbf16>
    %c2_149 = arith.constant 2 : index
    %c0_150 = arith.constant 0 : index
    %139 = vector.load %arg18[%c2_149, %c0_150] : memref<20x128xbf16, #tpu.memory_space<vmem>>, vector<16x128xbf16>
    tpu.vector_store %arg18[%c2_149, %c0_150], %138 {strides = array<i32>} : memref<20x128xbf16, #tpu.memory_space<vmem>>, vector<16x128xbf16>,
    %c0_151 = arith.constant 0 : index
    %c0_152 = arith.constant 0 : index
    %140 = vector.load %arg18[%c0_151, %c0_152] : memref<20x128xbf16, #tpu.memory_space<vmem>>, vector<16x128xbf16>
    %c0_153 = arith.constant 0 : index
    %c0_154 = arith.constant 0 : index
    %c0_155 = arith.constant 0 : index
    %141 = vector.load %arg6[%c0_153, %c0_154, %c0_155] : memref<5x128x128xbf16, #tpu.memory_space<vmem>>, vector<1x128x128xbf16>
    %142 = vector.shape_cast %141 : vector<1x128x128xbf16> to vector<128x128xbf16>
    %cst_156 = arith.constant dense<0.000000e+00> : vector<16x128xf32>
    %143 = tpu.matmul %140, %142, %cst_156 {dimension_numbers = #tpu.dot_dimension_numbers<[1], [0], [0], [1], [0, 0, 1, 1], [], []>} : vector<16x128xbf16>, vector<128x128xbf16>, vector<16x128xf32> -> vector<16x128xf32>
    %c1_157 = arith.constant 1 : index
    %c0_158 = arith.constant 0 : index
    %144 = vector.load %arg18[%c1_157, %c0_158] : memref<20x128xbf16, #tpu.memory_space<vmem>>, vector<16x128xbf16>
    %c1_159 = arith.constant 1 : index
    %c0_160 = arith.constant 0 : index
    %c0_161 = arith.constant 0 : index
    %145 = vector.load %arg6[%c1_159, %c0_160, %c0_161] : memref<5x128x128xbf16, #tpu.memory_space<vmem>>, vector<1x128x128xbf16>
    %146 = vector.shape_cast %145 : vector<1x128x128xbf16> to vector<128x128xbf16>
    %cst_162 = arith.constant dense<0.000000e+00> : vector<16x128xf32>
    %147 = tpu.matmul %144, %146, %cst_162 {dimension_numbers = #tpu.dot_dimension_numbers<[1], [0], [0], [1], [0, 0, 1, 1], [], []>} : vector<16x128xbf16>, vector<128x128xbf16>, vector<16x128xf32> -> vector<16x128xf32>
    %148 = arith.addf %143, %147 : vector<16x128xf32>
    %c2_163 = arith.constant 2 : index
    %c0_164 = arith.constant 0 : index
    %149 = vector.load %arg18[%c2_163, %c0_164] : memref<20x128xbf16, #tpu.memory_space<vmem>>, vector<16x128xbf16>
    %c2_165 = arith.constant 2 : index
    %c0_166 = arith.constant 0 : index
    %c0_167 = arith.constant 0 : index
    %150 = vector.load %arg6[%c2_165, %c0_166, %c0_167] : memref<5x128x128xbf16, #tpu.memory_space<vmem>>, vector<1x128x128xbf16>
    %151 = vector.shape_cast %150 : vector<1x128x128xbf16> to vector<128x128xbf16>
    %cst_168 = arith.constant dense<0.000000e+00> : vector<16x128xf32>
    %152 = tpu.matmul %149, %151, %cst_168 {dimension_numbers = #tpu.dot_dimension_numbers<[1], [0], [0], [1], [0, 0, 1, 1], [], []>} : vector<16x128xbf16>, vector<128x128xbf16>, vector<16x128xf32> -> vector<16x128xf32>
    %153 = arith.addf %148, %152 : vector<16x128xf32>
    %c3_169 = arith.constant 3 : index
    %c0_170 = arith.constant 0 : index
    %154 = vector.load %arg18[%c3_169, %c0_170] : memref<20x128xbf16, #tpu.memory_space<vmem>>, vector<16x128xbf16>
    %c3_171 = arith.constant 3 : index
    %c0_172 = arith.constant 0 : index
    %c0_173 = arith.constant 0 : index
    %155 = vector.load %arg6[%c3_171, %c0_172, %c0_173] : memref<5x128x128xbf16, #tpu.memory_space<vmem>>, vector<1x128x128xbf16>
    %156 = vector.shape_cast %155 : vector<1x128x128xbf16> to vector<128x128xbf16>
    %cst_174 = arith.constant dense<0.000000e+00> : vector<16x128xf32>
    %157 = tpu.matmul %154, %156, %cst_174 {dimension_numbers = #tpu.dot_dimension_numbers<[1], [0], [0], [1], [0, 0, 1, 1], [], []>} : vector<16x128xbf16>, vector<128x128xbf16>, vector<16x128xf32> -> vector<16x128xf32>
    %158 = arith.addf %153, %157 : vector<16x128xf32>
    %c4_175 = arith.constant 4 : index
    %c0_176 = arith.constant 0 : index
    %159 = vector.load %arg18[%c4_175, %c0_176] : memref<20x128xbf16, #tpu.memory_space<vmem>>, vector<16x128xbf16>
    %c4_177 = arith.constant 4 : index
    %c0_178 = arith.constant 0 : index
    %c0_179 = arith.constant 0 : index
    %160 = vector.load %arg6[%c4_177, %c0_178, %c0_179] : memref<5x128x128xbf16, #tpu.memory_space<vmem>>, vector<1x128x128xbf16>
    %161 = vector.shape_cast %160 : vector<1x128x128xbf16> to vector<128x128xbf16>
    %cst_180 = arith.constant dense<0.000000e+00> : vector<16x128xf32>
    %162 = tpu.matmul %159, %161, %cst_180 {dimension_numbers = #tpu.dot_dimension_numbers<[1], [0], [0], [1], [0, 0, 1, 1], [], []>} : vector<16x128xbf16>, vector<128x128xbf16>, vector<16x128xf32> -> vector<16x128xf32>
    %163 = arith.addf %158, %162 : vector<16x128xf32>
    %c0_181 = arith.constant 0 : index
    %c0_182 = arith.constant 0 : index
    %164 = vector.load %arg11[%c0_181, %c0_182] : memref<1x128xf32, #tpu.memory_space<vmem>>, vector<1x128xf32>
    %165 = vector.broadcast %164 : vector<1x128xf32> to vector<16x128xf32>
    %166 = arith.mulf %163, %165 : vector<16x128xf32>
    %c0_183 = arith.constant 0 : index
    %c0_184 = arith.constant 0 : index
    %167 = vector.load %arg16[%c0_183, %c0_184] : memref<1x128xf32, #tpu.memory_space<vmem>>, vector<1x128xf32>
    %168 = vector.broadcast %167 : vector<1x128xf32> to vector<16x128xf32>
    %169 = arith.addf %166, %168 : vector<16x128xf32>
    %c0_185 = arith.constant 0 : index
    %c0_186 = arith.constant 0 : index
    %c0_187 = arith.constant 0 : index
    %170 = vector.load %arg17[%c0_185, %c0_186, %c0_187] : memref<1x16x128xf32, #tpu.memory_space<vmem>>, vector<1x16x128xf32>
    %171 = vector.shape_cast %170 : vector<1x16x128xf32> to vector<16x128xf32>
    %172 = vector.shape_cast %169 : vector<16x128xf32> to vector<1x16x128xf32>
    tpu.vector_store %arg17[%c0_185, %c0_186, %c0_187], %172 {strides = array<i32>} : memref<1x16x128xf32, #tpu.memory_space<vmem>>, vector<1x16x128xf32>,
    return
  }
  func.func @transform_0(%arg0: i32) -> (i32, i32, i32) {
    %c0_i32 = arith.constant 0 : i32
    %c0_i32_0 = arith.constant 0 : i32
    %c0_i32_1 = arith.constant 0 : i32
    return %arg0, %c0_i32, %c0_i32_0 : i32, i32, i32
  }
  func.func @transform_1(%arg0: i32) -> (i32, i32, i32) {
    %c0_i32 = arith.constant 0 : i32
    %c0_i32_0 = arith.constant 0 : i32
    %c0_i32_1 = arith.constant 0 : i32
    %c0_i32_2 = arith.constant 0 : i32
    return %c0_i32, %c0_i32_0, %c0_i32_1 : i32, i32, i32
  }
  func.func @transform_2(%arg0: i32) -> (i32, i32, i32) {
    %c0_i32 = arith.constant 0 : i32
    %c0_i32_0 = arith.constant 0 : i32
    %c0_i32_1 = arith.constant 0 : i32
    %c0_i32_2 = arith.constant 0 : i32
    return %c0_i32, %c0_i32_0, %c0_i32_1 : i32, i32, i32
  }
  func.func @transform_3(%arg0: i32) -> (i32, i32, i32) {
    %c0_i32 = arith.constant 0 : i32
    %c0_i32_0 = arith.constant 0 : i32
    %c0_i32_1 = arith.constant 0 : i32
    %c0_i32_2 = arith.constant 0 : i32
    return %c0_i32, %c0_i32_0, %c0_i32_1 : i32, i32, i32
  }
  func.func @transform_4(%arg0: i32) -> (i32, i32, i32) {
    %c0_i32 = arith.constant 0 : i32
    %c0_i32_0 = arith.constant 0 : i32
    %c0_i32_1 = arith.constant 0 : i32
    %c0_i32_2 = arith.constant 0 : i32
    return %c0_i32, %c0_i32_0, %c0_i32_1 : i32, i32, i32
  }
  func.func @transform_5(%arg0: i32) -> (i32, i32, i32) {
    %c0_i32 = arith.constant 0 : i32
    %c0_i32_0 = arith.constant 0 : i32
    %c0_i32_1 = arith.constant 0 : i32
    %c0_i32_2 = arith.constant 0 : i32
    return %c0_i32, %c0_i32_0, %c0_i32_1 : i32, i32, i32
  }
  func.func @transform_6(%arg0: i32) -> (i32, i32) {
    %c0_i32 = arith.constant 0 : i32
    %c0_i32_0 = arith.constant 0 : i32
    %c0_i32_1 = arith.constant 0 : i32
    return %c0_i32, %c0_i32_0 : i32, i32
  }
  func.func @transform_7(%arg0: i32) -> (i32, i32) {
    %c0_i32 = arith.constant 0 : i32
    %c0_i32_0 = arith.constant 0 : i32
    %c0_i32_1 = arith.constant 0 : i32
    return %c0_i32, %c0_i32_0 : i32, i32
  }
  func.func @transform_8(%arg0: i32) -> (i32, i32) {
    %c0_i32 = arith.constant 0 : i32
    %c0_i32_0 = arith.constant 0 : i32
    %c0_i32_1 = arith.constant 0 : i32
    return %c0_i32, %c0_i32_0 : i32, i32
  }
  func.func @transform_9(%arg0: i32) -> (i32, i32) {
    %c0_i32 = arith.constant 0 : i32
    %c0_i32_0 = arith.constant 0 : i32
    %c0_i32_1 = arith.constant 0 : i32
    return %c0_i32, %c0_i32_0 : i32, i32
  }
  func.func @transform_10(%arg0: i32) -> (i32, i32) {
    %c0_i32 = arith.constant 0 : i32
    %c0_i32_0 = arith.constant 0 : i32
    %c0_i32_1 = arith.constant 0 : i32
    return %c0_i32, %c0_i32_0 : i32, i32
  }
  func.func @transform_11(%arg0: i32) -> (i32, i32) {
    %c0_i32 = arith.constant 0 : i32
    %c0_i32_0 = arith.constant 0 : i32
    %c0_i32_1 = arith.constant 0 : i32
    return %c0_i32, %c0_i32_0 : i32, i32
  }
  func.func @transform_12(%arg0: i32) -> (i32, i32) {
    %c0_i32 = arith.constant 0 : i32
    %c0_i32_0 = arith.constant 0 : i32
    %c0_i32_1 = arith.constant 0 : i32
    return %c0_i32, %c0_i32_0 : i32, i32
  }
  func.func @transform_13(%arg0: i32) -> (i32, i32) {
    %c0_i32 = arith.constant 0 : i32
    %c0_i32_0 = arith.constant 0 : i32
    %c0_i32_1 = arith.constant 0 : i32
    return %c0_i32, %c0_i32_0 : i32, i32
  }
  func.func @transform_14(%arg0: i32) -> (i32, i32) {
    %c0_i32 = arith.constant 0 : i32
    %c0_i32_0 = arith.constant 0 : i32
    %c0_i32_1 = arith.constant 0 : i32
    return %c0_i32, %c0_i32_0 : i32, i32
  }
  func.func @transform_15(%arg0: i32) -> (i32, i32) {
    %c0_i32 = arith.constant 0 : i32
    %c0_i32_0 = arith.constant 0 : i32
    %c0_i32_1 = arith.constant 0 : i32
    return %c0_i32, %c0_i32_0 : i32, i32
  }
  func.func @transform_16(%arg0: i32) -> (i32, i32, i32) {
    %c0_i32 = arith.constant 0 : i32
    %c0_i32_0 = arith.constant 0 : i32
    %c0_i32_1 = arith.constant 0 : i32
    return %arg0, %c0_i32, %c0_i32_0 : i32, i32, i32
  }
}

</mosaic_0001>

<bundles_post_ra>
// kernel: tpu_custom_call.1
= control target key start
LH: loop header
LB: loop body
LE: loop exit
PB: predicated region body
PF: predicated region fallthrough
CT: control target
= control target key end

     0   :  { %s6258_s0 = inlined_call_operand.hbm [shape: bf16[2,16,128], index: 0, kind: input, shape index: {}]   ;;  %s6259_s1 = inlined_call_operand.hbm [shape: bf16[5,128,128], index: 1, kind: input, shape index: {}]   ;;  %s6260_s2 = inlined_call_operand.hbm [shape: bf16[5,128,128], index: 2, kind: input, shape index: {}]   ;;  %s6261_s3 = inlined_call_operand.hbm [shape: bf16[5,128,128], index: 3, kind: input, shape index: {}]   ;;  %s6262_s4 = inlined_call_operand.hbm [shape: bf16[5,128,128], index: 4, kind: input, shape index: {}]   ;;  %s6263_s5 = inlined_call_operand.hbm [shape: bf16[5,128,128], index: 5, kind: input, shape index: {}]   ;;  %s6264_s6 = inlined_call_operand.vmem [shape: f32[1,128], index: 6, kind: input, shape index: {}]   ;;  %s6265_s7 = inlined_call_operand.vmem [shape: f32[1,128], index: 7, kind: input, shape index: {}]   ;;  %s6266_s8 = inlined_call_operand.vmem [shape: f32[1,128], index: 8, kind: input, shape index: {}]   ;;  %s6267_s9 = inlined_call_operand.vmem [shape: f32[1,128], index: 9, kind: input, shape index: {}]   ;;  %s6268_s10 = inlined_call_operand.vmem [shape: f32[1,128], index: 10, kind: input, shape index: {}]   ;;  %s6269_s11 = inlined_call_operand.vmem [shape: f32[1,128], index: 11, kind: input, shape index: {}]   ;;  %s6270_s12 = inlined_call_operand.vmem [shape: f32[1,128], index: 12, kind: input, shape index: {}]   ;;  %s6271_s13 = inlined_call_operand.vmem [shape: f32[1,128], index: 13, kind: input, shape index: {}]   ;;  %s6272_s14 = inlined_call_operand.vmem [shape: f32[1,128], index: 14, kind: input, shape index: {}]   ;;  %s6273_s15 = inlined_call_operand.vmem [shape: f32[1,128], index: 15, kind: input, shape index: {}]   ;;  %s6274_s16 = inlined_call_operand.hbm [shape: f32[2,16,128], index: 16, kind: output, shape index: {}]  }
   0x1   :  { %6286 = sst [smem:[#allocation24_spill]] %s6258_s0 }
   0x2   :  { %6287 = sst [smem:[#allocation25_spill]] %s6259_s1 }
   0x3   :  { %6288 = sst [smem:[#allocation26_spill]] %s6260_s2 }
   0x4   :  { %6289 = sst [smem:[#allocation27_spill]] %s6261_s3 }
   0x5   :  { %6290 = sst [smem:[#allocation28_spill]] %s6262_s4 }
   0x6   :  { %6291 = sst [smem:[#allocation29_spill]] %s6263_s5 }
   0x7   :  { %6292 = sst [smem:[#allocation30_spill]] %s6273_s15 }
   0x8   :  { %6293 = sst [smem:[#allocation31_spill]] %s6274_s16 }
   0x9   :  { %21 = vsyncpa [#allocation5], 0 }
   0xa   :  { %23 = vsyncpa [#allocation5 + $0x1], 0 }
   0xb   :  { %24 = vsyncpa [#allocation8], 0 }
   0xc   :  { %25 = vsyncpa [#allocation11], 0 }
   0xd   :  { %26 = vsyncpa [#allocation14], 0 }
   0xe   :  { %27 = vsyncpa [#allocation6], 0 }
   0xf   :  { %29 = vsyncpa [#allocation6 + $0x1], 0  ;;  %s5615_s21 = smov 0   ;;  %s5617_s22 = smov 0  }
  0x10   :  { %s5619_s23 = smov 0   ;;  %s5621_s24 = smov 0  }
  0x11 LB: > { %6294 = sst [smem:[#allocation21_spill]] %s5510_s23  ;;  %s5516_s25 = smov [#allocation7]   ;;  %s5514_s24 = sphi %s5621_s24, %s6327_s24   ;;  %s5510_s23 = sphi %s5619_s23, %s6329_s23   ;;  %s5506_s22 = sphi %s5617_s22, %s6331_s22   ;;  %s5502_s21 = sphi %s5615_s21, %s6330_s21  }
  0x12   : > { %s419_s26 = sshll.u32 %s5516_s25, 4  ;;  %s5636_s27 = sadd.s32 4294967295, %s5514_s24   ;;  %s420_s26 = int_to_ptr.vmem [resolvable:$true] %s419_s26 }
  0x13   : > { %p3934_p0 = scmp.ge.s32.totalorder %s5514_s24, 1  ;;  %p6279_p1 = scmp.eq.s32.totalorder %s5636_s27, 0 }
  0x14   : > { %p407_p2 = scmp.lt.s32.totalorder %s5514_s24, 3  ;;  %s5517_s29 = smov [#allocation10]  }
  0x15   : > { %s445_s30 = sshll.u32 %s5517_s29, 4  ;;  %s5518_s17 = smov [#allocation9]   ;;  %s5654_s30 = int_to_ptr.vmem [resolvable:$true] %s445_s30 }
  0x16   : > { %p5641_p3 = pnand %p3934_p0, %p407_p2  ;;  %s432_s18 = sshll.u32 %s5518_s17, 4  ;;  %s5656_s18 = int_to_ptr.vmem [resolvable:$true] %s432_s18 }
  0x17   : > { %s5291_s20 = scalar_lea.vmem %s420_s26, 5120  ;;  %p5299_p11 = scmp.lt.s32.totalorder %s420_s26, %s420_s26 }
  0x18   : > { %s6295_s28 = scalar_select %p5641_p3, 1, 0 }
  0x19   : > { %p4959_p5 = pneg %p5641_p3  ;;  %p5292_p8 = scmp.ne.s32.totalorder %s420_s26, %s5291_s20 }
  0x1a   : > { %p5300_p12 = scmp.lt.s32.totalorder %s5291_s20, %s5291_s20 }
  0x1b   : > { %p5650_p6 = pnand %p4959_p5, %p6279_p1 }
  0x1c   : > { %p5301_p13 = por %p5300_p12, %p5299_p11 }
  0x1d   : > { %p5660_p7 = pneg %p5650_p6 }
  0x1f   : > { %p5294_p9 = pnand %p5292_p8, %p5660_p7 }
  0x21   : > { %p5295_p10 = pneg %p5294_p9 }
  0x23   : > { %p5302_p0 = pnand %p5301_p13, %p5295_p10 }
  0x25   : > { %5305 = shalt.err (!%p5302_p0)
}
  0x26   : > { %s6277_s25 = smov 64   ;;  %s6278_s29 = smov 4  }
  0x27   : > { %s6298_s1 = sld [smem:[#allocation25_spill]]  ;;  %s5317_s15 = scalar_lea.vmem %s5654_s30, 5120 }
  0x28   : > { %p5318_p2 = scmp.ne.s32.totalorder %s5654_s30, %s5317_s15  ;;  %p5325_p9 = scmp.lt.s32.totalorder %s5654_s30, %s5654_s30 }
  0x29   : > { %p5326_p10 = scmp.lt.s32.totalorder %s5317_s15, %s5317_s15 }
  0x2a   : > { %p5320_p5 = pnand %p5318_p2, %p5660_p7 }
  0x2b   : > { %p5327_p11 = por %p5326_p10, %p5325_p9 }
  0x2c   : > { %p5321_p8 = pneg %p5320_p5 }
  0x2d   : > { %4962 = dma.hbm_to_vmem [thread:$0]  (!%p5650_p6), %s6298_s1, 5120, %s420_s26, [#allocation8], %s6277_s25, %s6277_s25, %s6278_s29  }
  0x2e   : > { %p5328_p12 = pnand %p5327_p11, %p5321_p8 }
  0x30   : > { %5331 = shalt.err (!%p5328_p12)
}
  0x31   : > { %s6299_s3 = sld [smem:[#allocation27_spill]]  ;;  %s5343_s26 = scalar_lea.vmem %s5656_s18, 5120 }
  0x32   : > { %p5344_p13 = scmp.ne.s32.totalorder %s5656_s18, %s5343_s26  ;;  %p5351_p5 = scmp.lt.s32.totalorder %s5656_s18, %s5656_s18 }
  0x33   : > { %p5352_p8 = scmp.lt.s32.totalorder %s5343_s26, %s5343_s26 }
  0x34   : > { %p5346_p0 = pnand %p5344_p13, %p5660_p7 }
  0x35   : > { %p5353_p9 = por %p5352_p8, %p5351_p5 }
  0x36   : > { %p5347_p2 = pneg %p5346_p0 }
  0x37   : > { %4968 = dma.hbm_to_vmem [thread:$0]  (!%p5650_p6), %s6299_s3, 5120, %s5654_s30, [#allocation11], %s6277_s25, %s6277_s25, %s6278_s29  }
  0x38   : > { %p5354_p10 = pnand %p5353_p9, %p5347_p2 }
  0x3a   : > { %5357 = shalt.err (!%p5354_p10)
}
  0x3b   : > { %s6300_s2 = sld [smem:[#allocation26_spill]]  ;;  %s5521_s30 = smov [#allocation12]  }
  0x3c   : > { %s458_s20 = sshll.u32 %s5521_s30, 4  ;;  %s5522_s16 = smov [#allocation13]   ;;  %s459_s20 = int_to_ptr.vmem [resolvable:$true] %s458_s20 }
  0x3d   : > { %s471_s1 = sshll.u32 %s5522_s16, 4  ;;  %s5369_s26 = scalar_lea.vmem %s459_s20, 5120  ;;  %s472_s1 = int_to_ptr.vmem [resolvable:$true] %s471_s1 }
  0x3e   : > { %p5370_p11 = scmp.ne.s32.totalorder %s459_s20, %s5369_s26  ;;  %p5377_p0 = scmp.lt.s32.totalorder %s459_s20, %s459_s20 }
  0x3f   : > { %p5378_p2 = scmp.lt.s32.totalorder %s5369_s26, %s5369_s26 }
  0x40   : > { %p5372_p12 = pnand %p5370_p11, %p5660_p7 }
  0x41   : > { %4965 = dma.hbm_to_vmem [thread:$0]  (!%p5650_p6), %s6300_s2, 5120, %s5656_s18, [#allocation8], %s6277_s25, %s6277_s25, %s6278_s29  }
  0x42   : > { %p5373_p13 = pneg %p5372_p12  ;;  %p5379_p5 = por %p5378_p2, %p5377_p0 }
  0x44   : > { %p5380_p8 = pnand %p5379_p5, %p5373_p13 }
  0x46   : > { %5383 = shalt.err (!%p5380_p8)
}
  0x47   : > { %s6301_s4 = sld [smem:[#allocation28_spill]]  ;;  %s5395_s17 = scalar_lea.vmem %s472_s1, 5120 }
  0x48   : > { %p5396_p9 = scmp.ne.s32.totalorder %s472_s1, %s5395_s17  ;;  %p5403_p12 = scmp.lt.s32.totalorder %s472_s1, %s472_s1 }
  0x49   : > { %p5404_p0 = scmp.lt.s32.totalorder %s5395_s17, %s5395_s17 }
  0x4a   : > { %p5398_p10 = pnand %p5396_p9, %p5660_p7 }
  0x4b   : > { %p5405_p13 = por %p5404_p0, %p5403_p12 }
  0x4c   : > { %p5399_p11 = pneg %p5398_p10 }
  0x4d   : > { %4971 = dma.hbm_to_vmem [thread:$0]  (!%p5650_p6), %s6301_s4, 5120, %s459_s20, [#allocation11], %s6277_s25, %s6277_s25, %s6278_s29  }
  0x4e   : > { %p5406_p2 = pnand %p5405_p13, %p5399_p11 }
  0x50   : > { %5409 = shalt.err (!%p5406_p2)
}
  0x51   : > { %s6302_s5 = sld [smem:[#allocation29_spill]]  ;;  %s3933_s0 = sadd.s32 4294967294, %s5514_s24  }
  0x52   : > { %s5726_s19 = sadd.s32 1, %s5514_s24   ;;  %s42_s20 = sadd.s32 1, %s5510_s23 }
  0x53   : > { %6303 = sst [smem:[#allocation22_spill]] %s5726_s19  ;;  %s39_s26 = ssub.s32 %s5514_s24, %s5726_s19 }
  0x54   : > { %p49_p7 = scmp.ne.s32.totalorder %s5510_s23, %s5506_s22  ;;  %p40_p5 = scmp.eq.s32.totalorder %s39_s26, 0 }
  0x55   : > { %p50_p8 = scmp.eq.s32.totalorder %s5514_s24, 0  ;;  %p55_p9 = scmp.ne.s32.totalorder %s5506_s22, %s5502_s21 }
  0x56   : > { %p394_p10 = scmp.eq.s32.totalorder %s5636_s27, 1  ;;  %p400_p0 = scmp.eq.s32.totalorder %s3933_s0, 1 }
  0x57   : > { %4974 = dma.hbm_to_vmem [thread:$0]  (!%p5650_p6), %s6302_s5, 5120, %s472_s1, [#allocation14], %s6277_s25, %s6277_s25, %s6278_s29  }
  0x58   : > { %s5738_s18 = scalar_select %p40_p5, %s5510_s23, %s42_s20  }
  0x59   : > { %p51_p11 = por %p50_p8, %p49_p7  ;;  %p5742_p12 = por %p6279_p1, %p55_p9 }
  0x5a   : > { %6304 = sst [smem:[#allocation23_spill]] %s5738_s18  ;;  %p5746_p6 = por %p394_p10, %p49_p7 }
  0x5b   : > { %s6305_s15 = scalar_select %p5742_p12, 1, 0 }
  0x5c   : > { %s6306_s1 = scalar_select %p5746_p6, 1, 0 }
  0x5d   : > { %p4988_p13 = scmp.lt.s32.totalorder %s5514_s24, 2  ;;  %s515_s17 = sand.u32 1, %s5510_s23  }
  0x5e   : > { %p5752_p2 = por %p400_p0, %p55_p9  ;;  %s3941_s16 = sshll.u32 %s515_s17, 3 }
  0x5f   : > { %s4200_s20 = sshll.u32 %s5514_s24, 7  ;;  %s6308_s29 = sld [smem:[#allocation24_spill]] }
  0x60   : > { %s6307_s30 = scalar_select %p5752_p2, 1, 0 }
  0x61   : > { %s519_s3 = scalar_lea.vmem [#allocation4], %s3941_s16  ;;  %p5762_p7 = pnand %p4988_p13, %p51_p11 }
  0x62   : > { %s526_s4 = sshll.u32 %s519_s3, 4  ;;  %s5768_s5 = scalar_lea.sflag [#allocation5], %s515_s17  ;;  %s5766_s4 = int_to_ptr.vmem [resolvable:$true] %s526_s4 }
  0x63   : > { %p5412_p8 = pneg %p5762_p7 }
  0x65   : > { %s5760_s2 = scalar_lea.hbm %s6308_s29, %s4200_s20  ;;  %s5415_s16 = scalar_lea.hbm %s6308_s29, 256 }
  0x66   : > { %s5410_s18 = scalar_lea.hbm %s5760_s2, 128  ;;  %p5416_p11 = scmp.lt.s32.totalorder %s5760_s2, %s6308_s29 }
  0x67   : > { %p5411_p5 = scmp.ne.s32.totalorder %s5760_s2, %s5410_s18  ;;  %p5417_p0 = scmp.lt.s32.totalorder %s5415_s16, %s5410_s18 }
  0x69   : > { %p5413_p9 = pnand %p5412_p8, %p5411_p5  ;;  %p5418_p13 = por %p5417_p0, %p5416_p11 }
  0x6b   : > { %p5414_p10 = pneg %p5413_p9 }
  0x6d   : > { %p5419_p4 = pnand %p5418_p13, %p5414_p10 }
  0x6f   : > { %5422 = shalt.err (!%p5419_p4)
}
  0x70   : > { %s5423_s17 = scalar_lea.vmem %s5766_s4, 128  ;;  %s5523_s23 = smov [#allocation4]  }
  0x71   : > { %p5424_p1 = scmp.ne.s32.totalorder %s5766_s4, %s5423_s17  ;;  %s5428_s19 = sshll.u32 %s5523_s23, 4  ;;  %s5429_s19 = int_to_ptr.vmem [resolvable:$false] %s5428_s19 }
  0x72   : > { %s5430_s25 = scalar_lea.vmem %s5429_s19, 256  ;;  %p5431_p9 = scmp.lt.s32.totalorder %s5766_s4, %s5429_s19 }
  0x73   : > { %p5426_p2 = pnand %p5424_p1, %p5412_p8  ;;  %p5432_p6 = scmp.lt.s32.totalorder %s5430_s25, %s5423_s17 }
  0x75   : > { %p5427_p5 = pneg %p5426_p2  ;;  %p5433_p12 = por %p5432_p6, %p5431_p9 }
  0x77   : > { %p5434_p3 = pnand %p5433_p12, %p5427_p5 }
  0x79   : > { %5437 = shalt.err (!%p5434_p3)
}
  0x7a   : > { %s6310_s18 = smov 4   ;;  %s6311_s20 = smov 64  }
  0x7b   : > { %4978 = dma.hbm_to_vmem [thread:$0]  (!%p5762_p7), %s5760_s2, 128, %s5766_s4, %s5768_s5, %s6311_s20, %s6311_s20, %s6310_s18  }
  0x7c   : > { %p6312_p1 = scmp.ne.s32.totalorder %s6295_s28, 0 }
  0x7d   : > { %s5795_s23 = sand.u32 (!%p6312_p1), 1, %s5506_s22   ;;  %p6313_p3 = scmp.ne.s32.totalorder (!%p6312_p1), %s6305_s15, 0 }
  0x7e   : > { %538 = sbr.rel (%p6312_p1) target bundleno = 1670 (0x686), region = 84  ;;  %s3945_s19 = sshll.u32 (!%p6312_p1), %s5795_s23, 3 }
  0x7f   : > { %s541_s16 = scalar_lea.sflag (!%p6312_p1), [#allocation5], %s5795_s23  ;;  %s5799_s3 = scalar_lea.vmem (!%p6312_p1), [#allocation4], %s3945_s19 }
  0x83   : > { %5481 = dma.done.wait (%p6313_p3), %s541_s16, 128  }
  0x84   : > { %5483 = vsyncadd (%p6313_p3), %s541_s16, 4294967168  ;;  %p6314_p4 = scmp.eq.s32.totalorder %s5636_s27, 0 }
  0x86   : > { %5485 = dma.done.wait (%p6314_p4), [#allocation8], 10240   ;;  %p6315_p12 = pmov %p6314_p4 }
  0x87   : > { %p6316_p6 = pmov %p6314_p4 }
  0x88   : > { %5487 = vsyncadd (%p6315_p12), [#allocation8], 4294957056 }
  0x89   : > { %5489 = dma.done.wait (%p6316_p6), [#allocation11], 10240   ;;  %p6317_p2 = pmov %p6314_p4 }
  0x8b   : > { %5491 = vsyncadd (%p6317_p2), [#allocation11], 4294957056  ;;  %p6318_p7 = pmov %p6317_p2 }
  0x8c   : > { %p6319_p8 = pmov %p6317_p2 }
  0x8d   : > { %5493 = dma.done.wait (%p6318_p7), [#allocation14], 5120  }
  0x8e   : > { %5495 = vsyncadd (%p6319_p8), [#allocation14], 4294962176  ;;  %v5524_v0 = vmov 0.0   ;;  %v5525_v1 = vmov 0   ;;  %vm5526_vm0 = vmmov 0   ;;  %v5039_v2 = vld [vmem:[#allocation7 + $0x78] sm:$0xff]  }
  0x8f   : > { %4435 = vmatprep.subr.bf16.mxu0 %v5524_v0  ;;  %4455 = vmatprep.subr.bf16.mxu1 %v5524_v0  ;;  %614 = vst [vmem:[#allocation2] sm:$0x1] %v5525_v1  ;;  %616 = vst [vmem:[#allocation3] sm:$0x1] %v5525_v1  ;;  %v5040_v3 = vld [vmem:[#allocation7 + $0x38] sm:$0xff]   ;;  %v5041_v4 = vld [vmem:[#allocation7 + $0x70] sm:$0xff]  }
  0x90   : > { %4451 = vmatprep.mubr.msk.bf16.mxu0 %vm5526_vm0, %v5524_v0  ;;  %4471 = vmatprep.mubr.msk.bf16.mxu1 %vm5526_vm0, %v5524_v0  ;;  %v5042_v5 = vld [vmem:[#allocation7 + $0x30] sm:$0xff]   ;;  %v5043_v6 = vld [vmem:[#allocation7 + $0x68] sm:$0xff]   ;;  %v5045_v8 = vld [vmem:[#allocation7 + $0x60] sm:$0xff]   ;;  %vm622_vm1 = vcmask 1040384   ;;  %vm623_vm2 = vcmask 1044484   ;;  %vm894_vm6 = vcmask 1046528  }
  0x91   : > { %4436 = vmatpush3.bf16.msra.mxu0 %v5039_v2  ;;  %4456 = vmatpush3.bf16.msra.mxu1 %v5040_v3  ;;  %v5044_v7 = vld [vmem:[#allocation7 + $0x28] sm:$0xff]   ;;  %v5046_v9 = vld [vmem:[#allocation7 + $0x20] sm:$0xff]   ;;  %v5047_v10 = vld [vmem:[#allocation7 + $0x58] sm:$0xff]   ;;  %vm680_vm4 = vsmask.f32 7424  ;;  %vm1142_vm7 = vcmask 1045504  }
  0x92   : > { %4437 = vmatprep.subr.bf16.mxu0 %v5524_v0  ;;  %4457 = vmatprep.subr.bf16.mxu1 %v5524_v0  ;;  %v5048_v11 = vld [vmem:[#allocation7 + $0x18] sm:$0xff]   ;;  %v5049_v14 = vld [vmem:[#allocation7 + $0x50] sm:$0xff]   ;;  %vm5833_vm3 = vmor %vm622_vm1, %vm623_vm2  ;;  %vm1011_vm5 = vsmask.f32 6400  ;;  %s3951_s5 = sshll.u32 %s5795_s23, 4  ;;  %s6322_s17 = sld [smem:[#allocation30_spill]] }
  0x93   : > { %v618_v12 = vld [vmem:[%s5799_s3] sm:$0xf]  ;;  %v619_v13 = vld [vmem:[%s5799_s3 + $0x4] sm:$0xf]  ;;  %v5051_v22 = vld [vmem:[#allocation7 + $0x48] sm:$0xff]   ;;  %s612_s25 = scalar_lea.vmem [#allocation15], %s3951_s5 }
  0x94   : > { %v625_v16 = vrot.slane %v618_v12, 7  ;;  %v627_v17 = vrot.slane %v619_v13, 7  ;;  %v5050_v18 = vld [vmem:[#allocation7 + $0x10] sm:$0xff]   ;;  %v5052_v23 = vld [vmem:[#allocation7 + $0x8] sm:$0xff]   ;;  %v5053_v24 = vld [vmem:[#allocation7 + $0x40] sm:$0xff]   ;;  %s3812_s18 = sshll.u32 %s612_s25, 4  ;;  %s6210_s18 = int_to_ptr.vmem [resolvable:$true] %s3812_s18 }
  0x95   : > { %4438 = vmatpush3.bf16.msra.mxu0 %v5041_v4  ;;  %4458 = vmatpush3.bf16.msra.mxu1 %v5042_v5  ;;  %v5054_v25 = vld [vmem:[#allocation7] sm:$0xff]   ;;  %v5058_v31 = vld [vmem:[#allocation7 + $0xf8] sm:$0xff]   ;;  %v5060_v37 = vld [vmem:[#allocation7 + $0xf0] sm:$0xff]   ;;  %s4209_s20 = sshll.u32 %s5636_s27, 8  ;;  %s6323_s3 = sld [smem:[#allocation31_spill]] }
  0x96   : > { %4439 = vmatprep.subr.bf16.mxu0 %v5524_v0  ;;  %4459 = vmatprep.subr.bf16.mxu1 %v5524_v0  ;;  %v626_v19 = vrot.slane %v625_v16, 4  ;;  %v629_v20 = vrot.slane %v627_v17, 4  ;;  %633 = vst [vmem:[#allocation2] sm:$0xe] %v625_v16  ;;  %v5057_v40 = vld [vmem:[#allocation7 + $0xb8] sm:$0xff]   ;;  %v5062_v43 = vld [vmem:[#allocation7 + $0xe8] sm:$0xff]  }
  0x97   : > { %v5059_v46 = vld [vmem:[#allocation7 + $0xb0] sm:$0xff]   ;;  %v5064_v49 = vld [vmem:[#allocation7 + $0xe0] sm:$0xff]   ;;  %v5061_v50 = vld [vmem:[#allocation7 + $0xa8] sm:$0xff]   ;;  %s3799_s4 = scalar_lea.sflag [#allocation6], %s5795_s23  ;;  %s5438_s5 = scalar_lea.vmem %s6210_s18, 256 }
  0x98   : > { %v628_v21 = vsel %vm5833_vm3, %v626_v19, %v627_v17  ;;  %635 = vst [vmem:[#allocation2 + $0x8] sm:$0x1] %v629_v20  ;;  %v5066_v58 = vld [vmem:[#allocation7 + $0xd8] sm:$0xff]   ;;  %v5063_v60 = vld [vmem:[#allocation7 + $0xa0] sm:$0xff]   ;;  %v5068_v63 = vld [vmem:[#allocation7 + $0xd0] sm:$0xff]   ;;  %p5439_p10 = scmp.ne.s32.totalorder %s6210_s18, %s5438_s5  ;;  %p6324_p11 = scmp.ne.s32.totalorder %s6306_s1, 0 }
  0x99   : > { %4440 = vmatpush3.bf16.msra.mxu0 %v5043_v6  ;;  %4460 = vmatpush3.bf16.msra.mxu1 %v5044_v7  ;;  %634 = vst [vmem:[#allocation2 + $0x4] sm:$0xf] %v628_v21  ;;  %v5065_v1 = vld [vmem:[#allocation7 + $0x98] sm:$0xff]   ;;  %v5070_v2 = vld [vmem:[#allocation7 + $0xc8] sm:$0xff]   ;;  %v5067_v3 = vld [vmem:[#allocation7 + $0x90] sm:$0xff]   ;;  %s5527_s27 = smov [#allocation15]  }
  0x9a   : > { %4441 = vmatprep.subr.bf16.mxu0 %v5524_v0  ;;  %4461 = vmatprep.subr.bf16.mxu1 %v5524_v0  ;;  %v5072_v4 = vld [vmem:[#allocation7 + $0xc0] sm:$0xff]   ;;  %v5069_v5 = vld [vmem:[#allocation7 + $0x88] sm:$0xff]   ;;  %v5076_v12 = vld [vmem:[#allocation7 + $0x130] sm:$0xff]   ;;  %p5440_p0 = pnand %p5439_p10, %p6324_p11  ;;  %s5442_s28 = sshll.u32 %s5527_s27, 4  ;;  %s5443_s28 = int_to_ptr.vmem [resolvable:$false] %s5442_s28 }
  0x9b   : > { %v5077_v13 = vld [vmem:[#allocation7 + $0x128] sm:$0xff]   ;;  %v5079_v16 = vld [vmem:[#allocation7 + $0x118] sm:$0xff]   ;;  %v5080_v17 = vld [vmem:[#allocation7 + $0x110] sm:$0xff]   ;;  %s6215_s2 = scalar_lea.hbm %s6323_s3, %s4209_s20  ;;  %s5444_s15 = scalar_lea.vmem %s5443_s28, 512 }
  0x9c   : > { %v5082_v19 = vld [vmem:[#allocation7 + $0x100] sm:$0xff]   ;;  %v5084_v21 = vld [vmem:[#allocation9 + $0x38] sm:$0xff]   ;;  %p5441_p13 = pneg %p5440_p0  ;;  %p5445_p5 = scmp.lt.s32.totalorder %s6210_s18, %s5443_s28 }
  0x9d   : > { %4442 = vmatpush3.bf16.msra.mxu0 %v5045_v8  ;;  %4462 = vmatpush3.bf16.msra.mxu1 %v5046_v9  ;;  %v636_v26 = vld [vmem:[#allocation2] sm:$0xf]  ;;  %v5071_v8 = vld [vmem:[#allocation7 + $0x80] sm:$0xff]   ;;  %p5446_p9 = scmp.lt.s32.totalorder %s5444_s15, %s5438_s5 }
  0x9e   : > { %4443 = vmatprep.subr.bf16.mxu0 %v5524_v0  ;;  %4463 = vmatprep.subr.bf16.mxu1 %v5524_v0  ;;  %v873_v36 = vld [vmem:[#allocation2] sm:$0xe] }
  0x9f   : > { %v5845_v27 = vld [vmem:[#allocation2 + $0x8] ss:$0 sps:$4 sm:$0x11]   ;;  %v1121_v57 = vld [vmem:[#allocation2] sm:$0xc]  ;;  %p5447_p1 = por %p5446_p9, %p5445_p5 }
  0xa0   : > { %v637_v28 = vld [vmem:[#allocation2 + $0x4] sm:$0xf]  ;;  %v689_v30 = vshll.u32 %v5845_v27, 16  ;;  %v5855_v41 = vld [vmem:[#allocation2 + $0x8] ss:$0 sps:$4 sm:$0x33]  }
  0xa1   : > { %4444 = vmatpush3.bf16.msra.mxu0 %v5047_v10  ;;  %4464 = vmatpush3.bf16.msra.mxu1 %v5048_v11  ;;  %v3952_v29 = vcombine.low %v636_v26, %v637_v28  ;;  %v5850_v38 = vcombine.low %v873_v36, %v637_v28  ;;  %v1021_v47 = vshrl.u32 %v5855_v41, 16  ;;  %v1024_v48 = vshll.u32 %v5855_v41, 16  ;;  %v5074_v10 = vld [vmem:[#allocation7 + $0x138] sm:$0xff]   ;;  %v5089_v26 = vld [vmem:[#allocation9 + $0x20] sm:$0xff]   ;;  %p5448_p3 = pnand %p5447_p1, %p5441_p13 }
  0xa2   : > { %4445 = vmatprep.subr.bf16.mxu0 %v5524_v0  ;;  %4465 = vmatprep.subr.bf16.mxu1 %v5524_v0  ;;  %v691_v35 = vrot.slane %v689_v30, 1  ;;  %v896_v52 = vrot.slane %v5845_v27, 1  ;;  %v3988_v59 = vcombine.low %v1121_v57, %v637_v28  ;;  %v1144_v62 = vrot.slane %v5855_v41, 2  ;;  %v5090_v27 = vld [vmem:[#allocation9 + $0x68] sm:$0xff]   ;;  %v5091_v28 = vld [vmem:[#allocation9 + $0x18] sm:$0xff]   ;;  %v5093_v30 = vld [vmem:[#allocation9 + $0x10] sm:$0xff]  }
  0xa3   : > { %v682_v32 = vshrl.u32 %v3952_v29, 16  ;;  %v684_v33 = vshll.u32 %v3952_v29, 16  ;;  %v1013_v44 = vshrl.u32 %v5850_v38, 16  ;;  %v1016_v45 = vshll.u32 %v5850_v38, 16  ;;  %v5101_v36 = vld [vmem:[#allocation9 + $0x40] sm:$0xff]  }
  0xa4   : > { %v895_v51 = vrot.slane %v5850_v38, 1  ;;  %v1023_v55 = vrot.slane %v1021_v47, 1  ;;  %v1026_v56 = vrot.slane %v1024_v48, 2  ;;  %v5870_v61 = vrot.slane %v3988_v59, 2  ;;  %v3997_v59 = vld [vmem:[%s6264_s6] ss:$0 sm:$0xff] }
  0xa5   : > { %4446 = vmatpush3.bf16.msra.mxu0 %v5049_v14  ;;  %4466 = vmatpush3.bf16.msra.mxu1 %v5050_v18  ;;  %v686_v34 = vrot.slane %v684_v33, 1  ;;  %v1015_v53 = vrot.slane %v1013_v44, 1  ;;  %v1018_v54 = vrot.slane %v1016_v45, 2  ;;  %v5078_v14 = vld [vmem:[#allocation7 + $0x120] sm:$0xff]   ;;  %v5081_v18 = vld [vmem:[#allocation7 + $0x108] sm:$0xff]   ;;  %v5096_v33 = vld [vmem:[#allocation9 + $0x50] sm:$0xff]  }
  0xa6   : > { %4447 = vmatprep.subr.bf16.mxu0 %v5524_v0  ;;  %4467 = vmatprep.subr.bf16.mxu1 %v5524_v0  ;;  %v1027_v7 = vor.u32 %v1026_v56, %v1023_v55  ;;  %v897_v11 = vsel %vm894_vm6, %v895_v51, %v896_v52  ;;  %v1145_v20 = vsel %vm1142_vm7, %v5870_v61, %v1144_v62  ;;  %v3998_v61 = vld [vmem:[%s6269_s11] ss:$0 sm:$0xff] }
  0xa7   : > { %v687_v39 = vor.u32 %v686_v34, %v682_v32  ;;  %v1019_v6 = vor.u32 %v1018_v54, %v1015_v53  ;;  %v5095_v32 = vld [vmem:[#allocation9 + $0x8] sm:$0xff]   ;;  %v5097_v34 = vld [vmem:[#allocation9] sm:$0xff]  }
  0xa9   : > { %4448 = vmatpush3.bf16.msra.mxu0 %v5051_v22  ;;  %4468 = vmatpush3.bf16.msra.mxu1 %v5052_v23  ;;  %v692_v42 = vsel %vm680_vm4, %v687_v39, %v691_v35  ;;  %v1028_v9 = vsel %vm1011_vm5, %v1019_v6, %v1027_v7  ;;  %v5085_v22 = vld [vmem:[#allocation9 + $0x30] sm:$0xff]   ;;  %v5086_v23 = vld [vmem:[#allocation9 + $0x78] sm:$0xff]   ;;  %v5098_v35 = vld [vmem:[#allocation9 + $0x48] sm:$0xff]  }
  0xaa   : > { %4449 = vmatprep.subr.bf16.mxu0 %v5524_v0  ;;  %4469 = vmatprep.subr.bf16.mxu1 %v5524_v0 }
  0xad   : > { %4450 = vmatpush3.bf16.msra.mxu0 %v5053_v24  ;;  %4470 = vmatpush3.bf16.msra.mxu1 %v5054_v25  ;;  %v5087_v24 = vld [vmem:[#allocation9 + $0x28] sm:$0xff]   ;;  %v5088_v25 = vld [vmem:[#allocation9 + $0x70] sm:$0xff]  }
  0xae   : > { %4475 = vmatprep.subr.bf16.mxu0 %v5524_v0  ;;  %4495 = vmatprep.subr.bf16.mxu1 %v5524_v0 }
  0xb0   : > { %4472 = vmatmul.mubr.bf16.vlgmr.msra.gmra.mxu1 %v3952_v29  ;;  %4452 = vmatmul.mubr.bf16.vlgmr.msra.gmra.mxu0 %v692_v42  ;;  %v5092_v29 = vld [vmem:[#allocation9 + $0x60] sm:$0xff]  }
  0xb1   : > { %4496 = vmatpush3.bf16.msra.mxu1 %v5058_v31  ;;  %4511 = vmatprep.mubr.msk.bf16.mxu1 %vm5526_vm0, %v5524_v0  ;;  %v5094_v31 = vld [vmem:[#allocation9 + $0x58] sm:$0xff]  }
  0xb2   : > { %4497 = vmatprep.subr.bf16.mxu1 %v5524_v0  ;;  %4476 = vmatpush3.bf16.msra.mxu0 %v5057_v40 }
  0xb3   : > { %4477 = vmatprep.subr.bf16.mxu0 %v5524_v0  ;;  %4491 = vmatprep.mubr.msk.bf16.mxu0 %vm5526_vm0, %v5524_v0 }
  0xb5   : > { %4498 = vmatpush3.bf16.msra.mxu1 %v5060_v37 }
  0xb6   : > { %4499 = vmatprep.subr.bf16.mxu1 %v5524_v0  ;;  %4478 = vmatpush3.bf16.msra.mxu0 %v5059_v46 }
  0xb7   : > { %4479 = vmatprep.subr.bf16.mxu0 %v5524_v0 }
  0xb9   : > { %4500 = vmatpush3.bf16.msra.mxu1 %v5062_v43 }
  0xba   : > { %4501 = vmatprep.subr.bf16.mxu1 %v5524_v0  ;;  %4480 = vmatpush3.bf16.msra.mxu0 %v5061_v50 }
  0xbb   : > { %4481 = vmatprep.subr.bf16.mxu0 %v5524_v0 }
  0xbd   : > { %4502 = vmatpush3.bf16.msra.mxu1 %v5064_v49 }
  0xbe   : > { %4503 = vmatprep.subr.bf16.mxu1 %v5524_v0  ;;  %4482 = vmatpush3.bf16.msra.mxu0 %v5063_v60 }
  0xbf   : > { %4483 = vmatprep.subr.bf16.mxu0 %v5524_v0 }
  0xc1   : > { %4504 = vmatpush3.bf16.msra.mxu1 %v5066_v58 }
  0xc2   : > { %4505 = vmatprep.subr.bf16.mxu1 %v5524_v0  ;;  %4484 = vmatpush3.bf16.msra.mxu0 %v5065_v1 }
  0xc3   : > { %4485 = vmatprep.subr.bf16.mxu0 %v5524_v0 }
  0xc5   : > { %4506 = vmatpush3.bf16.msra.mxu1 %v5068_v63 }
  0xc6   : > { %4507 = vmatprep.subr.bf16.mxu1 %v5524_v0  ;;  %4486 = vmatpush3.bf16.msra.mxu0 %v5067_v3 }
  0xc7   : > { %4487 = vmatprep.subr.bf16.mxu0 %v5524_v0 }
  0xc9   : > { %4508 = vmatpush3.bf16.msra.mxu1 %v5070_v2 }
  0xca   : > { %4509 = vmatprep.subr.bf16.mxu1 %v5524_v0  ;;  %4488 = vmatpush3.bf16.msra.mxu0 %v5069_v5 }
  0xcb   : > { %4489 = vmatprep.subr.bf16.mxu0 %v5524_v0 }
  0xcd   : > { %4510 = vmatpush3.bf16.msra.mxu1 %v5072_v4 }
  0xce   : > { %4535 = vmatprep.subr.bf16.mxu1 %v5524_v0  ;;  %4490 = vmatpush3.bf16.msra.mxu0 %v5071_v8 }
  0xcf   : > { %4515 = vmatprep.subr.bf16.mxu0 %v5524_v0 }
  0xd0   : > { %4512 = vmatmul.mubr.bf16.vlgmr.msra.gmra.mxu1 %v1028_v9 }
  0xd1   : > { %4551 = vmatprep.mubr.msk.bf16.mxu1 %vm5526_vm0, %v5524_v0  ;;  %4492 = vmatmul.mubr.bf16.vlgmr.msra.gmra.mxu0 %v897_v11 }
  0xd2   : > { %4516 = vmatpush3.bf16.msra.mxu0 %v5074_v10  ;;  %4531 = vmatprep.mubr.msk.bf16.mxu0 %vm5526_vm0, %v5524_v0 }
  0xd3   : > { %4517 = vmatprep.subr.bf16.mxu0 %v5524_v0  ;;  %4536 = vmatpush3.bf16.msra.mxu1 %v5086_v23 }
  0xd4   : > { %4537 = vmatprep.subr.bf16.mxu1 %v5524_v0 }
  0xd6   : > { %4518 = vmatpush3.bf16.msra.mxu0 %v5076_v12 }
  0xd7   : > { %4519 = vmatprep.subr.bf16.mxu0 %v5524_v0  ;;  %4538 = vmatpush3.bf16.msra.mxu1 %v5088_v25  ;;  %v5102_v25 = vld [vmem:[#allocation9 + $0xf0] sm:$0xff]  }
  0xd8   : > { %4539 = vmatprep.subr.bf16.mxu1 %v5524_v0 }
  0xda   : > { %4520 = vmatpush3.bf16.msra.mxu0 %v5077_v13 }
  0xdb   : > { %4521 = vmatprep.subr.bf16.mxu0 %v5524_v0  ;;  %4540 = vmatpush3.bf16.msra.mxu1 %v5090_v27 }
  0xdc   : > { %4541 = vmatprep.subr.bf16.mxu1 %v5524_v0 }
  0xde   : > { %4522 = vmatpush3.bf16.msra.mxu0 %v5078_v14 }
  0xdf   : > { %4523 = vmatprep.subr.bf16.mxu0 %v5524_v0  ;;  %4542 = vmatpush3.bf16.msra.mxu1 %v5092_v29 }
  0xe0   : > { %4543 = vmatprep.subr.bf16.mxu1 %v5524_v0 }
  0xe2   : > { %4524 = vmatpush3.bf16.msra.mxu0 %v5079_v16 }
  0xe3   : > { %4525 = vmatprep.subr.bf16.mxu0 %v5524_v0  ;;  %4544 = vmatpush3.bf16.msra.mxu1 %v5094_v31  ;;  %v5105_v31 = vld [vmem:[#allocation9 + $0xe8] sm:$0xff]  }
  0xe4   : > { %4545 = vmatprep.subr.bf16.mxu1 %v5524_v0 }
  0xe6   : > { %4526 = vmatpush3.bf16.msra.mxu0 %v5080_v17 }
  0xe7   : > { %4527 = vmatprep.subr.bf16.mxu0 %v5524_v0  ;;  %4546 = vmatpush3.bf16.msra.mxu1 %v5096_v33  ;;  %v5106_v33 = vld [vmem:[#allocation9 + $0xb0] sm:$0xff]  }
  0xe8   : > { %4547 = vmatprep.subr.bf16.mxu1 %v5524_v0 }
  0xea   : > { %4528 = vmatpush3.bf16.msra.mxu0 %v5081_v18 }
  0xeb   : > { %4529 = vmatprep.subr.bf16.mxu0 %v5524_v0  ;;  %4548 = vmatpush3.bf16.msra.mxu1 %v5098_v35  ;;  %v5108_v35 = vld [vmem:[#allocation9 + $0xa8] sm:$0xff]  }
  0xec   : > { %4549 = vmatprep.subr.bf16.mxu1 %v5524_v0 }
  0xee   : > { %4530 = vmatpush3.bf16.msra.mxu0 %v5082_v19 }
  0xef   : > { %4555 = vmatprep.subr.bf16.mxu0 %v5524_v0  ;;  %4550 = vmatpush3.bf16.msra.mxu1 %v5101_v36  ;;  %v5109_v36 = vld [vmem:[#allocation9 + $0xd8] sm:$0xff]  }
  0xf0   : > { %4575 = vmatprep.subr.bf16.mxu1 %v5524_v0 }
  0xf1   : > { %4532 = vmatmul.mubr.bf16.vlgmr.msra.gmra.mxu0 %v1145_v20  ;;  %v5100_v20 = vld [vmem:[#allocation9 + $0xf8] sm:$0xff]  }
  0xf2   : > { %4571 = vmatprep.mubr.msk.bf16.mxu0 %vm5526_vm0, %v5524_v0  ;;  %4556 = vmatpush3.bf16.msra.mxu0 %v5084_v21 }
  0xf3   : > { %4557 = vmatprep.subr.bf16.mxu0 %v5524_v0 }
  0xf6   : > { %4558 = vmatpush3.bf16.msra.mxu0 %v5085_v22 }
  0xf7   : > { %4559 = vmatprep.subr.bf16.mxu0 %v5524_v0 }
  0xfa   : > { %4560 = vmatpush3.bf16.msra.mxu0 %v5087_v24 }
  0xfb   : > { %4561 = vmatprep.subr.bf16.mxu0 %v5524_v0 }
  0xfe   : > { %4562 = vmatpush3.bf16.msra.mxu0 %v5089_v26 }
  0xff   : > { %4563 = vmatprep.subr.bf16.mxu0 %v5524_v0 }
 0x102   : > { %4564 = vmatpush3.bf16.msra.mxu0 %v5091_v28 }
 0x103   : > { %4565 = vmatprep.subr.bf16.mxu0 %v5524_v0 }
 0x106   : > { %4566 = vmatpush3.bf16.msra.mxu0 %v5093_v30  ;;  %v5104_v30 = vld [vmem:[#allocation9 + $0xb8] sm:$0xff]  }
 0x107   : > { %4567 = vmatprep.subr.bf16.mxu0 %v5524_v0 }
 0x10a   : > { %4568 = vmatpush3.bf16.msra.mxu0 %v5095_v32 }
 0x10b   : > { %4569 = vmatprep.subr.bf16.mxu0 %v5524_v0 }
 0x10e   : > { %4570 = vmatpush3.bf16.msra.mxu0 %v5097_v34  ;;  %v5107_v34 = vld [vmem:[#allocation9 + $0xe0] sm:$0xff]  }
 0x10f   : > { %4595 = vmatprep.subr.bf16.mxu0 %v5524_v0 }
 0x170   : > { %v866_v37 = vpop.f32.mrf.mxu1  ;;  %v776_v40 = vpop.f32.mrf.mxu0 }
 0x171   : > { %v867_v53 = vadd.f32 %v866_v37, %v776_v40  ;;  %v5110_v40 = vld [vmem:[#allocation9 + $0xa0] sm:$0xff]  }
 0x172   : > { %v4473_v38 = vpop.f32.mrf.mxu1  ;;  %v4453_v42 = vpop.f32.mrf.mxu0 }
 0x174   : > { %v869_v39 = vpop.f32.mrf.mxu1  ;;  %v779_v43 = vpop.f32.mrf.mxu0 }
 0x175   : > { %v870_v55 = vadd.f32 %v869_v39, %v779_v43 }
 0x176   : > { %v4474_v41 = vpop.f32.mrf.mxu1  ;;  %v4454_v44 = vpop.f32.mrf.mxu0 }
 0x177   : > { %v5111_v41 = vld [vmem:[#allocation9 + $0xd0] sm:$0xff]  }
 0x190   : > { %v1112_v45 = vpop.f32.mrf.mxu1 }
 0x191   : > { %v981_v48 = vpop.f32.mrf.mxu0 }
 0x192   : > { %v4513_v46 = vpop.f32.mrf.mxu1  ;;  %v988_v54 = vadd.f32 %v981_v48, %v867_v53  ;;  %v5115_v53 = vld [vmem:[#allocation9 + $0xc0] sm:$0xff]  }
 0x193   : > { %v4493_v50 = vpop.f32.mrf.mxu0  ;;  %v5112_v46 = vld [vmem:[#allocation9 + $0x98] sm:$0xff]  }
 0x194   : > { %v1115_v47 = vpop.f32.mrf.mxu1  ;;  %v1119_v56 = vadd.f32 %v1112_v45, %v988_v54 }
 0x195   : > { %v984_v51 = vpop.f32.mrf.mxu0 }
 0x196   : > { %v4514_v49 = vpop.f32.mrf.mxu1  ;;  %v989_v57 = vadd.f32 %v984_v51, %v870_v55 }
 0x197   : > { %v4494_v52 = vpop.f32.mrf.mxu0 }
 0x198   : > { %v1120_v63 = vadd.f32 %v1115_v47, %v989_v57  ;;  %v5113_v47 = vld [vmem:[#allocation9 + $0xc8] sm:$0xff]   ;;  %v5114_v52 = vld [vmem:[#allocation9 + $0x90] sm:$0xff]  }
 0x1b1   : > { %v1229_v58 = vpop.f32.mrf.mxu0 }
 0x1b2   : > { %v1236_v60 = vadd.f32 %v1229_v58, %v1119_v56  ;;  %v5116_v56 = vld [vmem:[#allocation9 + $0x88] sm:$0xff]   ;;  %v5119_v58 = vld [vmem:[#allocation9 + $0x80] sm:$0xff]  }
 0x1b3   : > { %v4533_v62 = vpop.f32.mrf.mxu0 }
 0x1b4   : > { %v1245_v1 = vmul.f32 %v3997_v59, %v1236_v60 }
 0x1b5   : > { %v1232_v2 = vpop.f32.mrf.mxu0 }
 0x1b6   : > { %v1254_v3 = vadd.f32 %v3998_v61, %v1245_v1  ;;  %v1237_v4 = vadd.f32 %v1232_v2, %v1120_v63  ;;  %v5121_v63 = vld [vmem:[#allocation9 + $0x130] sm:$0xff]   ;;  %v5122_v1 = vld [vmem:[#allocation9 + $0x128] sm:$0xff]   ;;  %v5123_v2 = vld [vmem:[#allocation9 + $0x120] sm:$0xff]  }
 0x1b7   : > { %v4534_v5 = vpop.f32.mrf.mxu0 }
 0x1b8   : > { %5264 = vtanh.f32 %v1254_v3  ;;  %v1246_v6 = vmul.f32 %v3997_v59, %v1237_v4  ;;  %v5124_v3 = vld [vmem:[#allocation9 + $0x118] sm:$0xff]   ;;  %v5125_v4 = vld [vmem:[#allocation9 + $0x110] sm:$0xff]   ;;  %v5126_v5 = vld [vmem:[#allocation9 + $0x108] sm:$0xff]  }
 0x1ba   : > { %v1255_v7 = vadd.f32 %v3998_v61, %v1246_v6  ;;  %v5120_v61 = vld [vmem:[#allocation9 + $0x138] sm:$0xff]  }
 0x1bc   : > { %5266 = vtanh.f32 %v1255_v7 }
 0x1c5   : > { %v5265_v8 = vpop.eup %5264 }
 0x1c6   : > { %v4201_v9 = vpack.c.bf16 %v5265_v8, %v5265_v8  ;;  %v5127_v8 = vld [vmem:[#allocation9 + $0x100] sm:$0xff]  }
 0x1c8   : > { %v1264_v10 = vrot.slane %v4201_v9, 7 }
 0x1c9   : > { %v5267_v11 = vpop.eup %5266 }
 0x1ca   : > { %1272 = vst [vmem:[#allocation3] sm:$0xe] %v1264_v10  ;;  %v4202_v12 = vpack.c.bf16 %v5267_v11, %v5267_v11  ;;  %v1265_v13 = vrot.slane %v1264_v10, 4 }
 0x1cc   : > { %v1266_v14 = vrot.slane %v4202_v12, 7  ;;  %v5129_v12 = vld [vmem:[#allocation10 + $0x38] sm:$0xff]  }
 0x1ce   : > { %v1267_v16 = vsel %vm5833_vm3, %v1265_v13, %v1266_v14  ;;  %v1268_v17 = vrot.slane %v1266_v14, 4  ;;  %v5130_v13 = vld [vmem:[#allocation10 + $0x30] sm:$0xff]   ;;  %v5131_v14 = vld [vmem:[#allocation10 + $0x78] sm:$0xff]  }
 0x1cf   : > { %1273 = vst [vmem:[#allocation3 + $0x4] sm:$0xf] %v1267_v16  ;;  %v5132_v16 = vld [vmem:[#allocation10 + $0x28] sm:$0xff]  }
 0x1d0   : > { %1274 = vst [vmem:[#allocation3 + $0x8] sm:$0x1] %v1268_v17  ;;  %v5133_v17 = vld [vmem:[#allocation10 + $0x70] sm:$0xff]  }
 0x1d1   : > { %v1275_v18 = vld [vmem:[#allocation3] sm:$0xf] }
 0x1d2   : > { %v1511_v37 = vld [vmem:[#allocation3] sm:$0xe] }
 0x1d3   : > { %v1757_v6 = vld [vmem:[#allocation3] sm:$0xc] }
 0x1d6   : > { %v5928_v19 = vld [vmem:[#allocation3 + $0x4] sm:$0xf] }
 0x1d7   : > { %v4001_v21 = vcombine.low %v1275_v18, %v5928_v19  ;;  %v5931_v22 = vld [vmem:[#allocation3 + $0x8] ss:$0 sps:$4 sm:$0x11]   ;;  %v4019_v38 = vcombine.low %v1511_v37, %v5928_v19  ;;  %v4037_v7 = vcombine.low %v1757_v6, %v5928_v19  ;;  %v5134_v18 = vld [vmem:[#allocation10 + $0x20] sm:$0xff]  }
 0x1d8   : > { %v1327_v24 = vshll.u32 %v5931_v22, 16  ;;  %v5946_v39 = vld [vmem:[#allocation3 + $0x8] ss:$0 sps:$4 sm:$0x33]   ;;  %v1533_v60 = vrot.slane %v5931_v22, 1  ;;  %v5138_v22 = vld [vmem:[#allocation10 + $0x10] sm:$0xff]  }
 0x1d9   : > { %4572 = vmatmul.mubr.bf16.vlgmr.msra.gmra.mxu0 %v4001_v21  ;;  %v1322_v23 = vshll.u32 %v4001_v21, 16  ;;  %v1320_v26 = vshrl.u32 %v4001_v21, 16  ;;  %v1649_v42 = vshrl.u32 %v4019_v38, 16  ;;  %v1652_v43 = vshll.u32 %v4019_v38, 16  ;;  %v5135_v19 = vld [vmem:[#allocation10 + $0x68] sm:$0xff]   ;;  %v5137_v21 = vld [vmem:[#allocation10 + $0x60] sm:$0xff]  }
 0x1da   : > { %4596 = vmatpush3.bf16.msra.mxu0 %v5100_v20  ;;  %4611 = vmatprep.mubr.msk.bf16.mxu0 %vm5526_vm0, %v5524_v0  ;;  %v1329_v29 = vrot.slane %v1327_v24, 1  ;;  %v1657_v44 = vshrl.u32 %v5946_v39, 16  ;;  %v1660_v45 = vshll.u32 %v5946_v39, 16  ;;  %v1532_v59 = vrot.slane %v4019_v38, 1  ;;  %v5136_v20 = vld [vmem:[#allocation10 + $0x18] sm:$0xff]   ;;  %v5140_v24 = vld [vmem:[#allocation10 + $0x8] sm:$0xff]  }
 0x1db   : > { %4597 = vmatprep.subr.bf16.mxu0 %v5524_v0  ;;  %v1324_v27 = vrot.slane %v1322_v23, 1  ;;  %v1651_v48 = vrot.slane %v1649_v42, 1  ;;  %v1654_v49 = vrot.slane %v1652_v43, 2  ;;  %v1778_v9 = vrot.slane %v4037_v7, 2  ;;  %v5139_v23 = vld [vmem:[#allocation10 + $0x58] sm:$0xff]  }
 0x1dc   : > { %v1659_v50 = vrot.slane %v1657_v44, 1  ;;  %v1662_v51 = vrot.slane %v1660_v45, 2  ;;  %v1534_v62 = vsel %vm894_vm6, %v1532_v59, %v1533_v60  ;;  %v1779_v10 = vrot.slane %v5946_v39, 2 }
 0x1dd   : > { %v1325_v28 = vor.u32 %v1324_v27, %v1320_v26  ;;  %v1655_v54 = vor.u32 %v1654_v49, %v1651_v48  ;;  %v5142_v26 = vld [vmem:[#allocation10] sm:$0xff]   ;;  %v5143_v27 = vld [vmem:[#allocation10 + $0x48] sm:$0xff]  }
 0x1de   : > { %4598 = vmatpush3.bf16.msra.mxu0 %v5102_v25  ;;  %v1663_v55 = vor.u32 %v1662_v51, %v1659_v50  ;;  %v1780_v11 = vsel %vm1142_vm7, %v1778_v9, %v1779_v10  ;;  %v5141_v25 = vld [vmem:[#allocation10 + $0x50] sm:$0xff]   ;;  %v4046_v51 = vld [vmem:[%s6265_s7] ss:$0 sm:$0xff] }
 0x1df   : > { %v1330_v32 = vsel %vm680_vm4, %v1325_v28, %v1329_v29  ;;  %4599 = vmatprep.subr.bf16.mxu0 %v5524_v0  ;;  %v5146_v28 = vld [vmem:[#allocation10 + $0x40] sm:$0xff]  }
 0x1e0   : > { %4552 = vmatmul.mubr.bf16.vlgmr.msra.gmra.mxu1 %v1330_v32  ;;  %v1664_v57 = vsel %vm1011_vm5, %v1655_v54, %v1663_v55 }
 0x1e1   : > { %4576 = vmatpush3.bf16.msra.mxu1 %v5104_v30  ;;  %4591 = vmatprep.mubr.msk.bf16.mxu1 %vm5526_vm0, %v5524_v0 }
 0x1e2   : > { %4600 = vmatpush3.bf16.msra.mxu0 %v5105_v31  ;;  %4577 = vmatprep.subr.bf16.mxu1 %v5524_v0 }
 0x1e3   : > { %4601 = vmatprep.subr.bf16.mxu0 %v5524_v0 }
 0x1e5   : > { %4578 = vmatpush3.bf16.msra.mxu1 %v5106_v33 }
 0x1e6   : > { %4602 = vmatpush3.bf16.msra.mxu0 %v5107_v34  ;;  %4579 = vmatprep.subr.bf16.mxu1 %v5524_v0 }
 0x1e7   : > { %4603 = vmatprep.subr.bf16.mxu0 %v5524_v0 }
 0x1e9   : > { %4580 = vmatpush3.bf16.msra.mxu1 %v5108_v35 }
 0x1ea   : > { %4604 = vmatpush3.bf16.msra.mxu0 %v5109_v36  ;;  %4581 = vmatprep.subr.bf16.mxu1 %v5524_v0 }
 0x1eb   : > { %4605 = vmatprep.subr.bf16.mxu0 %v5524_v0 }
 0x1ed   : > { %4582 = vmatpush3.bf16.msra.mxu1 %v5110_v40 }
 0x1ee   : > { %4606 = vmatpush3.bf16.msra.mxu0 %v5111_v41  ;;  %4583 = vmatprep.subr.bf16.mxu1 %v5524_v0 }
 0x1ef   : > { %4607 = vmatprep.subr.bf16.mxu0 %v5524_v0 }
 0x1f1   : > { %4584 = vmatpush3.bf16.msra.mxu1 %v5112_v46 }
 0x1f2   : > { %4608 = vmatpush3.bf16.msra.mxu0 %v5113_v47  ;;  %4585 = vmatprep.subr.bf16.mxu1 %v5524_v0 }
 0x1f3   : > { %4609 = vmatprep.subr.bf16.mxu0 %v5524_v0 }
 0x1f5   : > { %4586 = vmatpush3.bf16.msra.mxu1 %v5114_v52 }
 0x1f6   : > { %4610 = vmatpush3.bf16.msra.mxu0 %v5115_v53  ;;  %4587 = vmatprep.subr.bf16.mxu1 %v5524_v0  ;;  %v4047_v53 = vld [vmem:[%s6270_s12] ss:$0 sm:$0xff] }
 0x1f7   : > { %4635 = vmatprep.subr.bf16.mxu0 %v5524_v0 }
 0x1f9   : > { %4588 = vmatpush3.bf16.msra.mxu1 %v5116_v56  ;;  %4612 = vmatmul.mubr.bf16.vlgmr.msra.gmra.mxu0 %v1664_v57 }
 0x1fa   : > { %4589 = vmatprep.subr.bf16.mxu1 %v5524_v0  ;;  %4651 = vmatprep.mubr.msk.bf16.mxu0 %vm5526_vm0, %v5524_v0 }
 0x1fb   : > { %4636 = vmatpush3.bf16.msra.mxu0 %v5131_v14 }
 0x1fc   : > { %4637 = vmatprep.subr.bf16.mxu0 %v5524_v0 }
 0x1fd   : > { %4590 = vmatpush3.bf16.msra.mxu1 %v5119_v58 }
 0x1fe   : > { %4615 = vmatprep.subr.bf16.mxu1 %v5524_v0 }
 0x1ff   : > { %4638 = vmatpush3.bf16.msra.mxu0 %v5133_v17  ;;  %v5147_v17 = vld [vmem:[#allocation10 + $0xf0] sm:$0xff]  }
 0x200   : > { %4592 = vmatmul.mubr.bf16.vlgmr.msra.gmra.mxu1 %v1534_v62  ;;  %4639 = vmatprep.subr.bf16.mxu0 %v5524_v0 }
 0x201   : > { %4616 = vmatpush3.bf16.msra.mxu1 %v5120_v61  ;;  %4631 = vmatprep.mubr.msk.bf16.mxu1 %vm5526_vm0, %v5524_v0 }
 0x202   : > { %4617 = vmatprep.subr.bf16.mxu1 %v5524_v0 }
 0x203   : > { %4640 = vmatpush3.bf16.msra.mxu0 %v5135_v19 }
 0x204   : > { %4641 = vmatprep.subr.bf16.mxu0 %v5524_v0 }
 0x205   : > { %4618 = vmatpush3.bf16.msra.mxu1 %v5121_v63 }
 0x206   : > { %4619 = vmatprep.subr.bf16.mxu1 %v5524_v0 }
 0x207   : > { %4642 = vmatpush3.bf16.msra.mxu0 %v5137_v21 }
 0x208   : > { %4643 = vmatprep.subr.bf16.mxu0 %v5524_v0 }
 0x209   : > { %4620 = vmatpush3.bf16.msra.mxu1 %v5122_v1 }
 0x20a   : > { %4621 = vmatprep.subr.bf16.mxu1 %v5524_v0 }
 0x20b   : > { %4644 = vmatpush3.bf16.msra.mxu0 %v5139_v23  ;;  %v5150_v23 = vld [vmem:[#allocation10 + $0xe8] sm:$0xff]  }
 0x20c   : > { %4645 = vmatprep.subr.bf16.mxu0 %v5524_v0 }
 0x20d   : > { %4622 = vmatpush3.bf16.msra.mxu1 %v5123_v2 }
 0x20e   : > { %4623 = vmatprep.subr.bf16.mxu1 %v5524_v0 }
 0x20f   : > { %4646 = vmatpush3.bf16.msra.mxu0 %v5141_v25  ;;  %v5151_v25 = vld [vmem:[#allocation10 + $0xb0] sm:$0xff]  }
 0x210   : > { %4647 = vmatprep.subr.bf16.mxu0 %v5524_v0 }
 0x211   : > { %4624 = vmatpush3.bf16.msra.mxu1 %v5124_v3 }
 0x212   : > { %4625 = vmatprep.subr.bf16.mxu1 %v5524_v0 }
 0x213   : > { %4648 = vmatpush3.bf16.msra.mxu0 %v5143_v27  ;;  %v5153_v27 = vld [vmem:[#allocation10 + $0xa8] sm:$0xff]  }
 0x214   : > { %4649 = vmatprep.subr.bf16.mxu0 %v5524_v0 }
 0x215   : > { %4626 = vmatpush3.bf16.msra.mxu1 %v5125_v4 }
 0x216   : > { %4627 = vmatprep.subr.bf16.mxu1 %v5524_v0 }
 0x217   : > { %4650 = vmatpush3.bf16.msra.mxu0 %v5146_v28  ;;  %v5154_v28 = vld [vmem:[#allocation10 + $0xd8] sm:$0xff]  }
 0x218   : > { %4675 = vmatprep.subr.bf16.mxu0 %v5524_v0 }
 0x219   : > { %4628 = vmatpush3.bf16.msra.mxu1 %v5126_v5 }
 0x21a   : > { %4629 = vmatprep.subr.bf16.mxu1 %v5524_v0 }
 0x21d   : > { %4630 = vmatpush3.bf16.msra.mxu1 %v5127_v8 }
 0x21e   : > { %4655 = vmatprep.subr.bf16.mxu1 %v5524_v0 }
 0x220   : > { %4632 = vmatmul.mubr.bf16.vlgmr.msra.gmra.mxu1 %v1780_v11  ;;  %v5145_v11 = vld [vmem:[#allocation10 + $0xf8] sm:$0xff]  }
 0x221   : > { %4671 = vmatprep.mubr.msk.bf16.mxu1 %vm5526_vm0, %v5524_v0  ;;  %4656 = vmatpush3.bf16.msra.mxu1 %v5129_v12 }
 0x222   : > { %4657 = vmatprep.subr.bf16.mxu1 %v5524_v0 }
 0x225   : > { %4658 = vmatpush3.bf16.msra.mxu1 %v5130_v13 }
 0x226   : > { %4659 = vmatprep.subr.bf16.mxu1 %v5524_v0 }
 0x229   : > { %4660 = vmatpush3.bf16.msra.mxu1 %v5132_v16 }
 0x22a   : > { %4661 = vmatprep.subr.bf16.mxu1 %v5524_v0 }
 0x22d   : > { %4662 = vmatpush3.bf16.msra.mxu1 %v5134_v18 }
 0x22e   : > { %4663 = vmatprep.subr.bf16.mxu1 %v5524_v0 }
 0x231   : > { %4664 = vmatpush3.bf16.msra.mxu1 %v5136_v20 }
 0x232   : > { %4665 = vmatprep.subr.bf16.mxu1 %v5524_v0 }
 0x235   : > { %4666 = vmatpush3.bf16.msra.mxu1 %v5138_v22  ;;  %v5149_v22 = vld [vmem:[#allocation10 + $0xb8] sm:$0xff]  }
 0x236   : > { %4667 = vmatprep.subr.bf16.mxu1 %v5524_v0 }
 0x239   : > { %4668 = vmatpush3.bf16.msra.mxu1 %v5140_v24 }
 0x23a   : > { %4669 = vmatprep.subr.bf16.mxu1 %v5524_v0 }
 0x23d   : > { %4670 = vmatpush3.bf16.msra.mxu1 %v5142_v26  ;;  %v5152_v26 = vld [vmem:[#allocation10 + $0xe0] sm:$0xff]  }
 0x23e   : > { %4695 = vmatprep.subr.bf16.mxu1 %v5524_v0 }
 0x299   : > { %v1504_v29 = vpop.f32.mrf.mxu0 }
 0x29b   : > { %v4573_v30 = vpop.f32.mrf.mxu0 }
 0x29d   : > { %v1507_v31 = vpop.f32.mrf.mxu0 }
 0x29f   : > { %v4574_v32 = vpop.f32.mrf.mxu0 }
 0x2a0   : > { %v1414_v33 = vpop.f32.mrf.mxu1  ;;  %v5155_v32 = vld [vmem:[#allocation10 + $0xa0] sm:$0xff]  }
 0x2a1   : > { %v1505_v45 = vadd.f32 %v1504_v29, %v1414_v33  ;;  %v5156_v33 = vld [vmem:[#allocation10 + $0xd0] sm:$0xff]  }
 0x2a2   : > { %v4553_v34 = vpop.f32.mrf.mxu1 }
 0x2a4   : > { %v1417_v35 = vpop.f32.mrf.mxu1 }
 0x2a5   : > { %v1508_v47 = vadd.f32 %v1507_v31, %v1417_v35 }
 0x2a6   : > { %v4554_v36 = vpop.f32.mrf.mxu1 }
 0x2b9   : > { %v1748_v37 = vpop.f32.mrf.mxu0 }
 0x2bb   : > { %v4613_v38 = vpop.f32.mrf.mxu0 }
 0x2bc   : > { %v5157_v38 = vld [vmem:[#allocation10 + $0x98] sm:$0xff]  }
 0x2bd   : > { %v1751_v39 = vpop.f32.mrf.mxu0 }
 0x2bf   : > { %v4614_v40 = vpop.f32.mrf.mxu0 }
 0x2c0   : > { %v1618_v41 = vpop.f32.mrf.mxu1 }
 0x2c1   : > { %v1625_v46 = vadd.f32 %v1618_v41, %v1505_v45  ;;  %v5160_v45 = vld [vmem:[#allocation10 + $0xc0] sm:$0xff]  }
 0x2c2   : > { %v4593_v42 = vpop.f32.mrf.mxu1 }
 0x2c3   : > { %v1755_v49 = vadd.f32 %v1748_v37, %v1625_v46 }
 0x2c4   : > { %v1621_v43 = vpop.f32.mrf.mxu1 }
 0x2c5   : > { %v1626_v48 = vadd.f32 %v1621_v43, %v1508_v47 }
 0x2c6   : > { %v4594_v44 = vpop.f32.mrf.mxu1 }
 0x2c7   : > { %v1756_v56 = vadd.f32 %v1751_v39, %v1626_v48  ;;  %v5158_v39 = vld [vmem:[#allocation10 + $0xc8] sm:$0xff]   ;;  %v5159_v44 = vld [vmem:[#allocation10 + $0x90] sm:$0xff]  }
 0x2c8   : > { %v5161_v48 = vld [vmem:[#allocation10 + $0x88] sm:$0xff]  }
 0x2e0   : > { %v1864_v50 = vpop.f32.mrf.mxu1 }
 0x2e1   : > { %v1871_v52 = vadd.f32 %v1864_v50, %v1755_v49  ;;  %v5164_v50 = vld [vmem:[#allocation10 + $0x80] sm:$0xff]  }
 0x2e2   : > { %v4633_v54 = vpop.f32.mrf.mxu1 }
 0x2e3   : > { %v1880_v55 = vmul.f32 %v4046_v51, %v1871_v52 }
 0x2e4   : > { %v1867_v57 = vpop.f32.mrf.mxu1 }
 0x2e5   : > { %v1889_v58 = vadd.f32 %v4047_v53, %v1880_v55  ;;  %v1872_v59 = vadd.f32 %v1867_v57, %v1756_v56  ;;  %v5166_v55 = vld [vmem:[#allocation10 + $0x130] sm:$0xff]   ;;  %v5167_v56 = vld [vmem:[#allocation10 + $0x128] sm:$0xff]   ;;  %v5168_v57 = vld [vmem:[#allocation10 + $0x120] sm:$0xff]  }
 0x2e6   : > { %v4634_v60 = vpop.f32.mrf.mxu1 }
 0x2e7   : > { %5268 = vtanh.f32 %v1889_v58  ;;  %v1881_v61 = vmul.f32 %v4046_v51, %v1872_v59  ;;  %v5169_v58 = vld [vmem:[#allocation10 + $0x118] sm:$0xff]   ;;  %v5170_v59 = vld [vmem:[#allocation10 + $0x110] sm:$0xff]   ;;  %v5171_v60 = vld [vmem:[#allocation10 + $0x108] sm:$0xff]  }
 0x2e9   : > { %v1890_v62 = vadd.f32 %v4047_v53, %v1881_v61  ;;  %v5165_v53 = vld [vmem:[#allocation10 + $0x138] sm:$0xff]  }
 0x2eb   : > { %5270 = vtanh.f32 %v1890_v62 }
 0x2f4   : > { %v5269_v63 = vpop.eup %5268 }
 0x2f5   : > { %v4203_v1 = vpack.c.bf16 %v5269_v63, %v5269_v63  ;;  %v5172_v63 = vld [vmem:[#allocation10 + $0x100] sm:$0xff]  }
 0x2f7   : > { %v1899_v2 = vrot.slane %v4203_v1, 7 }
 0x2f8   : > { %v5271_v3 = vpop.eup %5270 }
 0x2f9   : > { %1907 = vst [vmem:[#allocation2] sm:$0xe] %v1899_v2  ;;  %v4204_v4 = vpack.c.bf16 %v5271_v3, %v5271_v3  ;;  %v1900_v5 = vrot.slane %v1899_v2, 4 }
 0x2fb   : > { %v1901_v6 = vrot.slane %v4204_v4, 7  ;;  %v5174_v4 = vld [vmem:[#allocation12 + $0x38] sm:$0xff]  }
 0x2fd   : > { %v1902_v7 = vsel %vm5833_vm3, %v1900_v5, %v1901_v6  ;;  %v1903_v8 = vrot.slane %v1901_v6, 4  ;;  %v5175_v5 = vld [vmem:[#allocation12 + $0x30] sm:$0xff]   ;;  %v5176_v6 = vld [vmem:[#allocation12 + $0x78] sm:$0xff]  }
 0x2fe   : > { %1908 = vst [vmem:[#allocation2 + $0x4] sm:$0xf] %v1902_v7  ;;  %v5177_v7 = vld [vmem:[#allocation12 + $0x28] sm:$0xff]  }
 0x2ff   : > { %1909 = vst [vmem:[#allocation2 + $0x8] sm:$0x1] %v1903_v8  ;;  %v5178_v8 = vld [vmem:[#allocation12 + $0x70] sm:$0xff]  }
 0x300   : > { %v1910_v9 = vld [vmem:[#allocation2] sm:$0xf] }
 0x301   : > { %v2146_v29 = vld [vmem:[#allocation2] sm:$0xe] }
 0x302   : > { %v2392_v61 = vld [vmem:[#allocation2] sm:$0xc] }
 0x305   : > { %v6004_v10 = vld [vmem:[#allocation2 + $0x4] sm:$0xf] }
 0x306   : > { %v4050_v12 = vcombine.low %v1910_v9, %v6004_v10  ;;  %v6007_v13 = vld [vmem:[#allocation2 + $0x8] ss:$0 sps:$4 sm:$0x11]   ;;  %v4068_v30 = vcombine.low %v2146_v29, %v6004_v10  ;;  %v4086_v62 = vcombine.low %v2392_v61, %v6004_v10  ;;  %v5180_v10 = vld [vmem:[#allocation12 + $0x68] sm:$0xff]  }
 0x307   : > { %v1962_v16 = vshll.u32 %v6007_v13, 16  ;;  %v6022_v31 = vld [vmem:[#allocation2 + $0x8] ss:$0 sps:$4 sm:$0x33]   ;;  %v2168_v52 = vrot.slane %v6007_v13, 1  ;;  %v5183_v13 = vld [vmem:[#allocation12 + $0x10] sm:$0xff]  }
 0x308   : > { %4672 = vmatmul.mubr.bf16.vlgmr.msra.gmra.mxu1 %v4050_v12  ;;  %v1957_v14 = vshll.u32 %v4050_v12, 16  ;;  %v1955_v18 = vshrl.u32 %v4050_v12, 16  ;;  %v2284_v34 = vshrl.u32 %v4068_v30, 16  ;;  %v2287_v35 = vshll.u32 %v4068_v30, 16  ;;  %v5179_v9 = vld [vmem:[#allocation12 + $0x20] sm:$0xff]  }
 0x309   : > { %4696 = vmatpush3.bf16.msra.mxu1 %v5145_v11  ;;  %4711 = vmatprep.mubr.msk.bf16.mxu1 %vm5526_vm0, %v5524_v0  ;;  %v1964_v21 = vrot.slane %v1962_v16, 1  ;;  %v2292_v36 = vshrl.u32 %v6022_v31, 16  ;;  %v2295_v37 = vshll.u32 %v6022_v31, 16  ;;  %v2167_v51 = vrot.slane %v4068_v30, 1  ;;  %v5181_v11 = vld [vmem:[#allocation12 + $0x18] sm:$0xff]   ;;  %v5182_v12 = vld [vmem:[#allocation12 + $0x60] sm:$0xff]  }
 0x30a   : > { %4697 = vmatprep.subr.bf16.mxu1 %v5524_v0  ;;  %v1959_v19 = vrot.slane %v1957_v14, 1  ;;  %v2286_v40 = vrot.slane %v2284_v34, 1  ;;  %v2289_v41 = vrot.slane %v2287_v35, 2  ;;  %v2413_v1 = vrot.slane %v4086_v62, 2  ;;  %v5184_v14 = vld [vmem:[#allocation12 + $0x58] sm:$0xff]   ;;  %v5185_v16 = vld [vmem:[#allocation12 + $0x8] sm:$0xff]  }
 0x30b   : > { %v2294_v42 = vrot.slane %v2292_v36, 1  ;;  %v2297_v43 = vrot.slane %v2295_v37, 2  ;;  %v2169_v54 = vsel %vm894_vm6, %v2167_v51, %v2168_v52  ;;  %v2414_v2 = vrot.slane %v6022_v31, 2 }
 0x30c   : > { %v1960_v20 = vor.u32 %v1959_v19, %v1955_v18  ;;  %v2290_v46 = vor.u32 %v2289_v41, %v2286_v40  ;;  %v5187_v18 = vld [vmem:[#allocation12] sm:$0xff]   ;;  %v5188_v19 = vld [vmem:[#allocation12 + $0x48] sm:$0xff]  }
 0x30d   : > { %4698 = vmatpush3.bf16.msra.mxu1 %v5147_v17  ;;  %v2298_v47 = vor.u32 %v2297_v43, %v2294_v42  ;;  %v2415_v3 = vsel %vm1142_vm7, %v2413_v1, %v2414_v2  ;;  %v5186_v17 = vld [vmem:[#allocation12 + $0x50] sm:$0xff]   ;;  %v4095_v43 = vld [vmem:[%s6266_s8] ss:$0 sm:$0xff] }
 0x30e   : > { %v1965_v24 = vsel %vm680_vm4, %v1960_v20, %v1964_v21  ;;  %4699 = vmatprep.subr.bf16.mxu1 %v5524_v0  ;;  %v5192_v20 = vld [vmem:[#allocation12 + $0x40] sm:$0xff]  }
 0x30f   : > { %4652 = vmatmul.mubr.bf16.vlgmr.msra.gmra.mxu0 %v1965_v24  ;;  %v2299_v49 = vsel %vm1011_vm5, %v2290_v46, %v2298_v47 }
 0x310   : > { %4676 = vmatpush3.bf16.msra.mxu0 %v5149_v22  ;;  %4691 = vmatprep.mubr.msk.bf16.mxu0 %vm5526_vm0, %v5524_v0 }
 0x311   : > { %4700 = vmatpush3.bf16.msra.mxu1 %v5150_v23  ;;  %4677 = vmatprep.subr.bf16.mxu0 %v5524_v0 }
 0x312   : > { %4701 = vmatprep.subr.bf16.mxu1 %v5524_v0 }
 0x314   : > { %4678 = vmatpush3.bf16.msra.mxu0 %v5151_v25 }
 0x315   : > { %4702 = vmatpush3.bf16.msra.mxu1 %v5152_v26  ;;  %4679 = vmatprep.subr.bf16.mxu0 %v5524_v0 }
 0x316   : > { %4703 = vmatprep.subr.bf16.mxu1 %v5524_v0 }
 0x318   : > { %4680 = vmatpush3.bf16.msra.mxu0 %v5153_v27 }
 0x319   : > { %4704 = vmatpush3.bf16.msra.mxu1 %v5154_v28  ;;  %4681 = vmatprep.subr.bf16.mxu0 %v5524_v0 }
 0x31a   : > { %4705 = vmatprep.subr.bf16.mxu1 %v5524_v0 }
 0x31c   : > { %4682 = vmatpush3.bf16.msra.mxu0 %v5155_v32 }
 0x31d   : > { %4706 = vmatpush3.bf16.msra.mxu1 %v5156_v33  ;;  %4683 = vmatprep.subr.bf16.mxu0 %v5524_v0 }
 0x31e   : > { %4707 = vmatprep.subr.bf16.mxu1 %v5524_v0 }
 0x320   : > { %4684 = vmatpush3.bf16.msra.mxu0 %v5157_v38 }
 0x321   : > { %4708 = vmatpush3.bf16.msra.mxu1 %v5158_v39  ;;  %4685 = vmatprep.subr.bf16.mxu0 %v5524_v0 }
 0x322   : > { %4709 = vmatprep.subr.bf16.mxu1 %v5524_v0 }
 0x324   : > { %4686 = vmatpush3.bf16.msra.mxu0 %v5159_v44 }
 0x325   : > { %4710 = vmatpush3.bf16.msra.mxu1 %v5160_v45  ;;  %4687 = vmatprep.subr.bf16.mxu0 %v5524_v0  ;;  %v4096_v45 = vld [vmem:[%s6271_s13] ss:$0 sm:$0xff] }
 0x326   : > { %4735 = vmatprep.subr.bf16.mxu1 %v5524_v0 }
 0x328   : > { %4688 = vmatpush3.bf16.msra.mxu0 %v5161_v48  ;;  %4712 = vmatmul.mubr.bf16.vlgmr.msra.gmra.mxu1 %v2299_v49 }
 0x329   : > { %4689 = vmatprep.subr.bf16.mxu0 %v5524_v0  ;;  %4751 = vmatprep.mubr.msk.bf16.mxu1 %vm5526_vm0, %v5524_v0 }
 0x32a   : > { %4736 = vmatpush3.bf16.msra.mxu1 %v5176_v6 }
 0x32b   : > { %4737 = vmatprep.subr.bf16.mxu1 %v5524_v0 }
 0x32c   : > { %4690 = vmatpush3.bf16.msra.mxu0 %v5164_v50 }
 0x32d   : > { %4715 = vmatprep.subr.bf16.mxu0 %v5524_v0 }
 0x32e   : > { %4738 = vmatpush3.bf16.msra.mxu1 %v5178_v8  ;;  %v5193_v8 = vld [vmem:[#allocation12 + $0xf0] sm:$0xff]  }
 0x32f   : > { %4692 = vmatmul.mubr.bf16.vlgmr.msra.gmra.mxu0 %v2169_v54  ;;  %4739 = vmatprep.subr.bf16.mxu1 %v5524_v0 }
 0x330   : > { %4716 = vmatpush3.bf16.msra.mxu0 %v5165_v53  ;;  %4731 = vmatprep.mubr.msk.bf16.mxu0 %vm5526_vm0, %v5524_v0 }
 0x331   : > { %4717 = vmatprep.subr.bf16.mxu0 %v5524_v0 }
 0x332   : > { %4740 = vmatpush3.bf16.msra.mxu1 %v5180_v10 }
 0x333   : > { %4741 = vmatprep.subr.bf16.mxu1 %v5524_v0 }
 0x334   : > { %4718 = vmatpush3.bf16.msra.mxu0 %v5166_v55 }
 0x335   : > { %4719 = vmatprep.subr.bf16.mxu0 %v5524_v0 }
 0x336   : > { %4742 = vmatpush3.bf16.msra.mxu1 %v5182_v12 }
 0x337   : > { %4743 = vmatprep.subr.bf16.mxu1 %v5524_v0 }
 0x338   : > { %4720 = vmatpush3.bf16.msra.mxu0 %v5167_v56 }
 0x339   : > { %4721 = vmatprep.subr.bf16.mxu0 %v5524_v0 }
 0x33a   : > { %4744 = vmatpush3.bf16.msra.mxu1 %v5184_v14  ;;  %v5196_v14 = vld [vmem:[#allocation12 + $0xe8] sm:$0xff]  }
 0x33b   : > { %4745 = vmatprep.subr.bf16.mxu1 %v5524_v0 }
 0x33c   : > { %4722 = vmatpush3.bf16.msra.mxu0 %v5168_v57 }
 0x33d   : > { %4723 = vmatprep.subr.bf16.mxu0 %v5524_v0 }
 0x33e   : > { %4746 = vmatpush3.bf16.msra.mxu1 %v5186_v17  ;;  %v5197_v17 = vld [vmem:[#allocation12 + $0xb0] sm:$0xff]  }
 0x33f   : > { %4747 = vmatprep.subr.bf16.mxu1 %v5524_v0 }
 0x340   : > { %4724 = vmatpush3.bf16.msra.mxu0 %v5169_v58 }
 0x341   : > { %4725 = vmatprep.subr.bf16.mxu0 %v5524_v0 }
 0x342   : > { %4748 = vmatpush3.bf16.msra.mxu1 %v5188_v19  ;;  %v5199_v19 = vld [vmem:[#allocation12 + $0xa8] sm:$0xff]  }
 0x343   : > { %4749 = vmatprep.subr.bf16.mxu1 %v5524_v0 }
 0x344   : > { %4726 = vmatpush3.bf16.msra.mxu0 %v5170_v59 }
 0x345   : > { %4727 = vmatprep.subr.bf16.mxu0 %v5524_v0 }
 0x346   : > { %4750 = vmatpush3.bf16.msra.mxu1 %v5192_v20  ;;  %v5200_v20 = vld [vmem:[#allocation12 + $0xd8] sm:$0xff]  }
 0x347   : > { %4775 = vmatprep.subr.bf16.mxu1 %v5524_v0 }
 0x348   : > { %4728 = vmatpush3.bf16.msra.mxu0 %v5171_v60 }
 0x349   : > { %4729 = vmatprep.subr.bf16.mxu0 %v5524_v0 }
 0x34c   : > { %4730 = vmatpush3.bf16.msra.mxu0 %v5172_v63 }
 0x34d   : > { %4755 = vmatprep.subr.bf16.mxu0 %v5524_v0 }
 0x34f   : > { %4732 = vmatmul.mubr.bf16.vlgmr.msra.gmra.mxu0 %v2415_v3  ;;  %v5191_v3 = vld [vmem:[#allocation12 + $0xf8] sm:$0xff]  }
 0x350   : > { %4771 = vmatprep.mubr.msk.bf16.mxu0 %vm5526_vm0, %v5524_v0  ;;  %4756 = vmatpush3.bf16.msra.mxu0 %v5174_v4 }
 0x351   : > { %4757 = vmatprep.subr.bf16.mxu0 %v5524_v0 }
 0x354   : > { %4758 = vmatpush3.bf16.msra.mxu0 %v5175_v5 }
 0x355   : > { %4759 = vmatprep.subr.bf16.mxu0 %v5524_v0 }
 0x358   : > { %4760 = vmatpush3.bf16.msra.mxu0 %v5177_v7 }
 0x359   : > { %4761 = vmatprep.subr.bf16.mxu0 %v5524_v0 }
 0x35c   : > { %4762 = vmatpush3.bf16.msra.mxu0 %v5179_v9 }
 0x35d   : > { %4763 = vmatprep.subr.bf16.mxu0 %v5524_v0 }
 0x360   : > { %4764 = vmatpush3.bf16.msra.mxu0 %v5181_v11 }
 0x361   : > { %4765 = vmatprep.subr.bf16.mxu0 %v5524_v0 }
 0x364   : > { %4766 = vmatpush3.bf16.msra.mxu0 %v5183_v13  ;;  %v5195_v13 = vld [vmem:[#allocation12 + $0xb8] sm:$0xff]  }
 0x365   : > { %4767 = vmatprep.subr.bf16.mxu0 %v5524_v0 }
 0x368   : > { %4768 = vmatpush3.bf16.msra.mxu0 %v5185_v16 }
 0x369   : > { %4769 = vmatprep.subr.bf16.mxu0 %v5524_v0 }
 0x36c   : > { %4770 = vmatpush3.bf16.msra.mxu0 %v5187_v18  ;;  %v5198_v18 = vld [vmem:[#allocation12 + $0xe0] sm:$0xff]  }
 0x36d   : > { %4795 = vmatprep.subr.bf16.mxu0 %v5524_v0 }
 0x3c8   : > { %v2139_v21 = vpop.f32.mrf.mxu1 }
 0x3ca   : > { %v4673_v22 = vpop.f32.mrf.mxu1 }
 0x3cc   : > { %v2142_v23 = vpop.f32.mrf.mxu1 }
 0x3ce   : > { %v4674_v24 = vpop.f32.mrf.mxu1 }
 0x3cf   : > { %v2049_v25 = vpop.f32.mrf.mxu0  ;;  %v5201_v24 = vld [vmem:[#allocation12 + $0xa0] sm:$0xff]  }
 0x3d0   : > { %v2140_v37 = vadd.f32 %v2139_v21, %v2049_v25  ;;  %v5202_v25 = vld [vmem:[#allocation12 + $0xd0] sm:$0xff]  }
 0x3d1   : > { %v4653_v26 = vpop.f32.mrf.mxu0 }
 0x3d3   : > { %v2052_v27 = vpop.f32.mrf.mxu0 }
 0x3d4   : > { %v2143_v39 = vadd.f32 %v2142_v23, %v2052_v27 }
 0x3d5   : > { %v4654_v28 = vpop.f32.mrf.mxu0 }
 0x3e8   : > { %v2383_v29 = vpop.f32.mrf.mxu1 }
 0x3ea   : > { %v4713_v30 = vpop.f32.mrf.mxu1 }
 0x3eb   : > { %v5203_v30 = vld [vmem:[#allocation12 + $0x98] sm:$0xff]  }
 0x3ec   : > { %v2386_v31 = vpop.f32.mrf.mxu1 }
 0x3ee   : > { %v4714_v32 = vpop.f32.mrf.mxu1 }
 0x3ef   : > { %v2253_v33 = vpop.f32.mrf.mxu0 }
 0x3f0   : > { %v2260_v38 = vadd.f32 %v2253_v33, %v2140_v37  ;;  %v5206_v37 = vld [vmem:[#allocation12 + $0xc0] sm:$0xff]  }
 0x3f1   : > { %v4693_v34 = vpop.f32.mrf.mxu0 }
 0x3f2   : > { %v2390_v41 = vadd.f32 %v2383_v29, %v2260_v38 }
 0x3f3   : > { %v2256_v35 = vpop.f32.mrf.mxu0 }
 0x3f4   : > { %v2261_v40 = vadd.f32 %v2256_v35, %v2143_v39 }
 0x3f5   : > { %v4694_v36 = vpop.f32.mrf.mxu0 }
 0x3f6   : > { %v2391_v48 = vadd.f32 %v2386_v31, %v2261_v40  ;;  %v5204_v31 = vld [vmem:[#allocation12 + $0xc8] sm:$0xff]   ;;  %v5205_v36 = vld [vmem:[#allocation12 + $0x90] sm:$0xff]  }
 0x3f7   : > { %v5207_v40 = vld [vmem:[#allocation12 + $0x88] sm:$0xff]  }
 0x40f   : > { %v2499_v42 = vpop.f32.mrf.mxu0 }
 0x410   : > { %v2506_v44 = vadd.f32 %v2499_v42, %v2390_v41  ;;  %v5209_v42 = vld [vmem:[#allocation12 + $0x80] sm:$0xff]  }
 0x411   : > { %v4733_v46 = vpop.f32.mrf.mxu0 }
 0x412   : > { %v2515_v47 = vmul.f32 %v4095_v43, %v2506_v44 }
 0x413   : > { %v2502_v49 = vpop.f32.mrf.mxu0 }
 0x414   : > { %v2524_v50 = vadd.f32 %v4096_v45, %v2515_v47  ;;  %v2507_v51 = vadd.f32 %v2502_v49, %v2391_v48  ;;  %v5211_v47 = vld [vmem:[#allocation12 + $0x130] sm:$0xff]   ;;  %v5212_v48 = vld [vmem:[#allocation12 + $0x128] sm:$0xff]   ;;  %v5213_v49 = vld [vmem:[#allocation12 + $0x120] sm:$0xff]  }
 0x415   : > { %v4734_v52 = vpop.f32.mrf.mxu0 }
 0x416   : > { %5272 = vtanh.f32 %v2524_v50  ;;  %v2516_v53 = vmul.f32 %v4095_v43, %v2507_v51  ;;  %v5214_v50 = vld [vmem:[#allocation12 + $0x118] sm:$0xff]   ;;  %v5215_v51 = vld [vmem:[#allocation12 + $0x110] sm:$0xff]   ;;  %v5216_v52 = vld [vmem:[#allocation12 + $0x108] sm:$0xff]  }
 0x418   : > { %v2525_v54 = vadd.f32 %v4096_v45, %v2516_v53  ;;  %v5210_v45 = vld [vmem:[#allocation12 + $0x138] sm:$0xff]  }
 0x41a   : > { %5274 = vtanh.f32 %v2525_v54 }
 0x423   : > { %v5273_v55 = vpop.eup %5272 }
 0x424   : > { %v4205_v56 = vpack.c.bf16 %v5273_v55, %v5273_v55  ;;  %v5217_v55 = vld [vmem:[#allocation12 + $0x100] sm:$0xff]  }
 0x426   : > { %v2534_v57 = vrot.slane %v4205_v56, 7 }
 0x427   : > { %v5275_v58 = vpop.eup %5274 }
 0x428   : > { %2542 = vst [vmem:[#allocation3] sm:$0xe] %v2534_v57  ;;  %v4206_v59 = vpack.c.bf16 %v5275_v58, %v5275_v58  ;;  %v2535_v60 = vrot.slane %v2534_v57, 4 }
 0x42a   : > { %v2536_v61 = vrot.slane %v4206_v59, 7  ;;  %v5219_v59 = vld [vmem:[#allocation13 + $0x38] sm:$0xff]  }
 0x42c   : > { %v2537_v62 = vsel %vm5833_vm3, %v2535_v60, %v2536_v61  ;;  %v2538_v63 = vrot.slane %v2536_v61, 4  ;;  %v5220_v60 = vld [vmem:[#allocation13 + $0x30] sm:$0xff]   ;;  %v5221_v61 = vld [vmem:[#allocation13 + $0x78] sm:$0xff]  }
 0x42d   : > { %2543 = vst [vmem:[#allocation3 + $0x4] sm:$0xf] %v2537_v62  ;;  %v5222_v62 = vld [vmem:[#allocation13 + $0x28] sm:$0xff]  }
 0x42e   : > { %2544 = vst [vmem:[#allocation3 + $0x8] sm:$0x1] %v2538_v63  ;;  %v5223_v63 = vld [vmem:[#allocation13 + $0x70] sm:$0xff]  }
 0x42f   : > { %v2545_v1 = vld [vmem:[#allocation3] sm:$0xf] }
 0x430   : > { %v2781_v21 = vld [vmem:[#allocation3] sm:$0xe] }
 0x431   : > { %v3027_v53 = vld [vmem:[#allocation3] sm:$0xc] }
 0x434   : > { %v6080_v2 = vld [vmem:[#allocation3 + $0x4] sm:$0xf] }
 0x435   : > { %v4099_v4 = vcombine.low %v2545_v1, %v6080_v2  ;;  %v6083_v5 = vld [vmem:[#allocation3 + $0x8] ss:$0 sps:$4 sm:$0x11]   ;;  %v4117_v22 = vcombine.low %v2781_v21, %v6080_v2  ;;  %v4135_v54 = vcombine.low %v3027_v53, %v6080_v2  ;;  %v5224_v1 = vld [vmem:[#allocation13 + $0x20] sm:$0xff]  }
 0x436   : > { %v2597_v7 = vshll.u32 %v6083_v5, 16  ;;  %v6098_v23 = vld [vmem:[#allocation3 + $0x8] ss:$0 sps:$4 sm:$0x33]   ;;  %v2803_v44 = vrot.slane %v6083_v5, 1  ;;  %v5228_v5 = vld [vmem:[#allocation13 + $0x10] sm:$0xff]  }
 0x437   : > { %4772 = vmatmul.mubr.bf16.vlgmr.msra.gmra.mxu0 %v4099_v4  ;;  %v2592_v6 = vshll.u32 %v4099_v4, 16  ;;  %v2590_v9 = vshrl.u32 %v4099_v4, 16  ;;  %v2919_v26 = vshrl.u32 %v4117_v22, 16  ;;  %v2922_v27 = vshll.u32 %v4117_v22, 16  ;;  %v5225_v2 = vld [vmem:[#allocation13 + $0x68] sm:$0xff]   ;;  %v5227_v4 = vld [vmem:[#allocation13 + $0x60] sm:$0xff]  }
 0x438   : > { %4796 = vmatpush3.bf16.msra.mxu0 %v5191_v3  ;;  %4811 = vmatprep.mubr.msk.bf16.mxu0 %vm5526_vm0, %v5524_v0  ;;  %v2599_v12 = vrot.slane %v2597_v7, 1  ;;  %v2927_v28 = vshrl.u32 %v6098_v23, 16  ;;  %v2930_v29 = vshll.u32 %v6098_v23, 16  ;;  %v2802_v43 = vrot.slane %v4117_v22, 1  ;;  %v5226_v3 = vld [vmem:[#allocation13 + $0x18] sm:$0xff]   ;;  %v5230_v7 = vld [vmem:[#allocation13 + $0x8] sm:$0xff]  }
 0x439   : > { %4797 = vmatprep.subr.bf16.mxu0 %v5524_v0  ;;  %v2594_v10 = vrot.slane %v2592_v6, 1  ;;  %v2921_v32 = vrot.slane %v2919_v26, 1  ;;  %v2924_v33 = vrot.slane %v2922_v27, 2  ;;  %v3048_v56 = vrot.slane %v4135_v54, 2  ;;  %v5229_v6 = vld [vmem:[#allocation13 + $0x58] sm:$0xff]  }
 0x43a   : > { %v2929_v34 = vrot.slane %v2927_v28, 1  ;;  %v2932_v35 = vrot.slane %v2930_v29, 2  ;;  %v2804_v46 = vsel %vm894_vm6, %v2802_v43, %v2803_v44  ;;  %v3049_v57 = vrot.slane %v6098_v23, 2 }
 0x43b   : > { %v2595_v11 = vor.u32 %v2594_v10, %v2590_v9  ;;  %v2925_v38 = vor.u32 %v2924_v33, %v2921_v32  ;;  %v5232_v9 = vld [vmem:[#allocation13] sm:$0xff]   ;;  %v5233_v10 = vld [vmem:[#allocation13 + $0x48] sm:$0xff]  }
 0x43c   : > { %4798 = vmatpush3.bf16.msra.mxu0 %v5193_v8  ;;  %v2933_v39 = vor.u32 %v2932_v35, %v2929_v34  ;;  %v3050_v58 = vsel %vm1142_vm7, %v3048_v56, %v3049_v57  ;;  %v5231_v8 = vld [vmem:[#allocation13 + $0x50] sm:$0xff]   ;;  %v4144_v35 = vld [vmem:[%s6267_s9] ss:$0 sm:$0xff] }
 0x43d   : > { %v2600_v16 = vsel %vm680_vm4, %v2595_v11, %v2599_v12  ;;  %4799 = vmatprep.subr.bf16.mxu0 %v5524_v0  ;;  %v5237_v11 = vld [vmem:[#allocation13 + $0x40] sm:$0xff]  }
 0x43e   : > { %4752 = vmatmul.mubr.bf16.vlgmr.msra.gmra.mxu1 %v2600_v16  ;;  %v2934_v41 = vsel %vm1011_vm5, %v2925_v38, %v2933_v39 }
 0x43f   : > { %4776 = vmatpush3.bf16.msra.mxu1 %v5195_v13  ;;  %4791 = vmatprep.mubr.msk.bf16.mxu1 %vm5526_vm0, %v5524_v0 }
 0x440   : > { %4800 = vmatpush3.bf16.msra.mxu0 %v5196_v14  ;;  %4777 = vmatprep.subr.bf16.mxu1 %v5524_v0 }
 0x441   : > { %4801 = vmatprep.subr.bf16.mxu0 %v5524_v0 }
 0x443   : > { %4778 = vmatpush3.bf16.msra.mxu1 %v5197_v17 }
 0x444   : > { %4802 = vmatpush3.bf16.msra.mxu0 %v5198_v18  ;;  %4779 = vmatprep.subr.bf16.mxu1 %v5524_v0 }
 0x445   : > { %4803 = vmatprep.subr.bf16.mxu0 %v5524_v0 }
 0x447   : > { %4780 = vmatpush3.bf16.msra.mxu1 %v5199_v19 }
 0x448   : > { %4804 = vmatpush3.bf16.msra.mxu0 %v5200_v20  ;;  %4781 = vmatprep.subr.bf16.mxu1 %v5524_v0 }
 0x449   : > { %4805 = vmatprep.subr.bf16.mxu0 %v5524_v0 }
 0x44b   : > { %4782 = vmatpush3.bf16.msra.mxu1 %v5201_v24 }
 0x44c   : > { %4806 = vmatpush3.bf16.msra.mxu0 %v5202_v25  ;;  %4783 = vmatprep.subr.bf16.mxu1 %v5524_v0 }
 0x44d   : > { %4807 = vmatprep.subr.bf16.mxu0 %v5524_v0 }
 0x44f   : > { %4784 = vmatpush3.bf16.msra.mxu1 %v5203_v30 }
 0x450   : > { %4808 = vmatpush3.bf16.msra.mxu0 %v5204_v31  ;;  %4785 = vmatprep.subr.bf16.mxu1 %v5524_v0 }
 0x451   : > { %4809 = vmatprep.subr.bf16.mxu0 %v5524_v0 }
 0x453   : > { %4786 = vmatpush3.bf16.msra.mxu1 %v5205_v36 }
 0x454   : > { %4810 = vmatpush3.bf16.msra.mxu0 %v5206_v37  ;;  %4787 = vmatprep.subr.bf16.mxu1 %v5524_v0  ;;  %v4145_v37 = vld [vmem:[%s6272_s14] ss:$0 sm:$0xff] }
 0x455   : > { %4835 = vmatprep.subr.bf16.mxu0 %v5524_v0 }
 0x457   : > { %4788 = vmatpush3.bf16.msra.mxu1 %v5207_v40  ;;  %4812 = vmatmul.mubr.bf16.vlgmr.msra.gmra.mxu0 %v2934_v41 }
 0x458   : > { %4789 = vmatprep.subr.bf16.mxu1 %v5524_v0  ;;  %4851 = vmatprep.mubr.msk.bf16.mxu0 %vm5526_vm0, %v5524_v0 }
 0x459   : > { %4836 = vmatpush3.bf16.msra.mxu0 %v5221_v61 }
 0x45a   : > { %4837 = vmatprep.subr.bf16.mxu0 %v5524_v0 }
 0x45b   : > { %4790 = vmatpush3.bf16.msra.mxu1 %v5209_v42 }
 0x45c   : > { %4815 = vmatprep.subr.bf16.mxu1 %v5524_v0 }
 0x45d   : > { %4838 = vmatpush3.bf16.msra.mxu0 %v5223_v63  ;;  %v5238_v63 = vld [vmem:[#allocation13 + $0xf0] sm:$0xff]  }
 0x45e   : > { %4792 = vmatmul.mubr.bf16.vlgmr.msra.gmra.mxu1 %v2804_v46  ;;  %4839 = vmatprep.subr.bf16.mxu0 %v5524_v0 }
 0x45f   : > { %4816 = vmatpush3.bf16.msra.mxu1 %v5210_v45  ;;  %4831 = vmatprep.mubr.msk.bf16.mxu1 %vm5526_vm0, %v5524_v0 }
 0x460   : > { %4817 = vmatprep.subr.bf16.mxu1 %v5524_v0 }
 0x461   : > { %4840 = vmatpush3.bf16.msra.mxu0 %v5225_v2 }
 0x462   : > { %4841 = vmatprep.subr.bf16.mxu0 %v5524_v0 }
 0x463   : > { %4818 = vmatpush3.bf16.msra.mxu1 %v5211_v47 }
 0x464   : > { %4819 = vmatprep.subr.bf16.mxu1 %v5524_v0 }
 0x465   : > { %4842 = vmatpush3.bf16.msra.mxu0 %v5227_v4  ;;  %v5240_v4 = vld [vmem:[#allocation13 + $0xb8] sm:$0xff]  }
 0x466   : > { %4843 = vmatprep.subr.bf16.mxu0 %v5524_v0 }
 0x467   : > { %4820 = vmatpush3.bf16.msra.mxu1 %v5212_v48 }
 0x468   : > { %4821 = vmatprep.subr.bf16.mxu1 %v5524_v0 }
 0x469   : > { %4844 = vmatpush3.bf16.msra.mxu0 %v5229_v6 }
 0x46a   : > { %4845 = vmatprep.subr.bf16.mxu0 %v5524_v0 }
 0x46b   : > { %4822 = vmatpush3.bf16.msra.mxu1 %v5213_v49 }
 0x46c   : > { %4823 = vmatprep.subr.bf16.mxu1 %v5524_v0 }
 0x46d   : > { %4846 = vmatpush3.bf16.msra.mxu0 %v5231_v8  ;;  %v5243_v8 = vld [vmem:[#allocation13 + $0xe0] sm:$0xff]  }
 0x46e   : > { %4847 = vmatprep.subr.bf16.mxu0 %v5524_v0 }
 0x46f   : > { %4824 = vmatpush3.bf16.msra.mxu1 %v5214_v50 }
 0x470   : > { %4825 = vmatprep.subr.bf16.mxu1 %v5524_v0 }
 0x471   : > { %4848 = vmatpush3.bf16.msra.mxu0 %v5233_v10  ;;  %v5245_v10 = vld [vmem:[#allocation13 + $0xd8] sm:$0xff]  }
 0x472   : > { %4849 = vmatprep.subr.bf16.mxu0 %v5524_v0 }
 0x473   : > { %4826 = vmatpush3.bf16.msra.mxu1 %v5215_v51 }
 0x474   : > { %4827 = vmatprep.subr.bf16.mxu1 %v5524_v0 }
 0x475   : > { %4850 = vmatpush3.bf16.msra.mxu0 %v5237_v11 }
 0x476   : > { %4875 = vmatprep.subr.bf16.mxu0 %v5524_v0 }
 0x477   : > { %4828 = vmatpush3.bf16.msra.mxu1 %v5216_v52 }
 0x478   : > { %4829 = vmatprep.subr.bf16.mxu1 %v5524_v0 }
 0x47b   : > { %4830 = vmatpush3.bf16.msra.mxu1 %v5217_v55 }
 0x47c   : > { %4855 = vmatprep.subr.bf16.mxu1 %v5524_v0 }
 0x47e   : > { %4832 = vmatmul.mubr.bf16.vlgmr.msra.gmra.mxu1 %v3050_v58  ;;  %v5236_v58 = vld [vmem:[#allocation13 + $0xf8] sm:$0xff]  }
 0x47f   : > { %4871 = vmatprep.mubr.msk.bf16.mxu1 %vm5526_vm0, %v5524_v0  ;;  %4856 = vmatpush3.bf16.msra.mxu1 %v5219_v59 }
 0x480   : > { %4857 = vmatprep.subr.bf16.mxu1 %v5524_v0 }
 0x483   : > { %4858 = vmatpush3.bf16.msra.mxu1 %v5220_v60 }
 0x484   : > { %4859 = vmatprep.subr.bf16.mxu1 %v5524_v0 }
 0x487   : > { %4860 = vmatpush3.bf16.msra.mxu1 %v5222_v62 }
 0x488   : > { %4861 = vmatprep.subr.bf16.mxu1 %v5524_v0 }
 0x48b   : > { %4862 = vmatpush3.bf16.msra.mxu1 %v5224_v1 }
 0x48c   : > { %4863 = vmatprep.subr.bf16.mxu1 %v5524_v0 }
 0x48f   : > { %4864 = vmatpush3.bf16.msra.mxu1 %v5226_v3 }
 0x490   : > { %4865 = vmatprep.subr.bf16.mxu1 %v5524_v0 }
 0x493   : > { %4866 = vmatpush3.bf16.msra.mxu1 %v5228_v5  ;;  %v5241_v5 = vld [vmem:[#allocation13 + $0xe8] sm:$0xff]  }
 0x494   : > { %4867 = vmatprep.subr.bf16.mxu1 %v5524_v0 }
 0x497   : > { %4868 = vmatpush3.bf16.msra.mxu1 %v5230_v7  ;;  %v5242_v7 = vld [vmem:[#allocation13 + $0xb0] sm:$0xff]  }
 0x498   : > { %4869 = vmatprep.subr.bf16.mxu1 %v5524_v0 }
 0x49b   : > { %4870 = vmatpush3.bf16.msra.mxu1 %v5232_v9  ;;  %v5244_v9 = vld [vmem:[#allocation13 + $0xa8] sm:$0xff]  }
 0x49c   : > { %4895 = vmatprep.subr.bf16.mxu1 %v5524_v0 }
 0x4f7   : > { %v2774_v12 = vpop.f32.mrf.mxu0 }
 0x4f9   : > { %v4773_v13 = vpop.f32.mrf.mxu0 }
 0x4fb   : > { %v2777_v14 = vpop.f32.mrf.mxu0 }
 0x4fd   : > { %v4774_v16 = vpop.f32.mrf.mxu0 }
 0x4fe   : > { %v2684_v17 = vpop.f32.mrf.mxu1  ;;  %v5247_v16 = vld [vmem:[#allocation13 + $0xd0] sm:$0xff]  }
 0x4ff   : > { %v2775_v29 = vadd.f32 %v2774_v12, %v2684_v17 }
 0x500   : > { %v4753_v18 = vpop.f32.mrf.mxu1 }
 0x502   : > { %v2687_v19 = vpop.f32.mrf.mxu1 }
 0x503   : > { %v2778_v31 = vadd.f32 %v2777_v14, %v2687_v19  ;;  %v5246_v14 = vld [vmem:[#allocation13 + $0xa0] sm:$0xff]  }
 0x504   : > { %v4754_v20 = vpop.f32.mrf.mxu1 }
 0x517   : > { %v3018_v21 = vpop.f32.mrf.mxu0 }
 0x519   : > { %v4813_v22 = vpop.f32.mrf.mxu0 }
 0x51a   : > { %v5249_v22 = vld [vmem:[#allocation13 + $0xc8] sm:$0xff]  }
 0x51b   : > { %v3021_v23 = vpop.f32.mrf.mxu0 }
 0x51d   : > { %v4814_v24 = vpop.f32.mrf.mxu0 }
 0x51e   : > { %v2888_v25 = vpop.f32.mrf.mxu1 }
 0x51f   : > { %v2895_v30 = vadd.f32 %v2888_v25, %v2775_v29 }
 0x520   : > { %v4793_v26 = vpop.f32.mrf.mxu1 }
 0x521   : > { %v3025_v33 = vadd.f32 %v3018_v21, %v2895_v30  ;;  %v5248_v21 = vld [vmem:[#allocation13 + $0x98] sm:$0xff]  }
 0x522   : > { %v2891_v27 = vpop.f32.mrf.mxu1 }
 0x523   : > { %v2896_v32 = vadd.f32 %v2891_v27, %v2778_v31  ;;  %v5250_v27 = vld [vmem:[#allocation13 + $0x90] sm:$0xff]   ;;  %v5252_v31 = vld [vmem:[#allocation13 + $0x88] sm:$0xff]  }
 0x524   : > { %v4794_v28 = vpop.f32.mrf.mxu1 }
 0x525   : > { %v3026_v40 = vadd.f32 %v3021_v23, %v2896_v32  ;;  %v5251_v28 = vld [vmem:[#allocation13 + $0xc0] sm:$0xff]  }
 0x53e   : > { %v3134_v34 = vpop.f32.mrf.mxu1 }
 0x53f   : > { %v3141_v36 = vadd.f32 %v3134_v34, %v3025_v33  ;;  %v5254_v33 = vld [vmem:[#allocation13 + $0x80] sm:$0xff]  }
 0x540   : > { %v4833_v38 = vpop.f32.mrf.mxu1 }
 0x541   : > { %v3150_v39 = vmul.f32 %v4144_v35, %v3141_v36  ;;  %v5255_v36 = vld [vmem:[#allocation13 + $0x138] sm:$0xff]   ;;  %v5256_v38 = vld [vmem:[#allocation13 + $0x130] sm:$0xff]  }
 0x542   : > { %v3137_v41 = vpop.f32.mrf.mxu1 }
 0x543   : > { %v3159_v42 = vadd.f32 %v4145_v37, %v3150_v39  ;;  %v3142_v43 = vadd.f32 %v3137_v41, %v3026_v40  ;;  %v5257_v39 = vld [vmem:[#allocation13 + $0x128] sm:$0xff]   ;;  %v5258_v40 = vld [vmem:[#allocation13 + $0x120] sm:$0xff]   ;;  %v5259_v41 = vld [vmem:[#allocation13 + $0x118] sm:$0xff]  }
 0x544   : > { %v4834_v44 = vpop.f32.mrf.mxu1 }
 0x545   : > { %5276 = vtanh.f32 %v3159_v42  ;;  %v3151_v45 = vmul.f32 %v4144_v35, %v3142_v43  ;;  %v5260_v42 = vld [vmem:[#allocation13 + $0x110] sm:$0xff]   ;;  %v5261_v43 = vld [vmem:[#allocation13 + $0x108] sm:$0xff]  }
 0x547   : > { %v3160_v46 = vadd.f32 %v4145_v37, %v3151_v45 }
 0x549   : > { %5278 = vtanh.f32 %v3160_v46  ;;  %v5262_v46 = vld [vmem:[#allocation13 + $0x100] sm:$0xff]  }
 0x552   : > { %v5277_v47 = vpop.eup %5276 }
 0x553   : > { %v4207_v48 = vpack.c.bf16 %v5277_v47, %v5277_v47 }
 0x555   : > { %v3169_v49 = vrot.slane %v4207_v48, 7 }
 0x556   : > { %v5279_v50 = vpop.eup %5278 }
 0x557   : > { %3177 = vst [vmem:[#allocation2] sm:$0xe] %v3169_v49  ;;  %v4208_v51 = vpack.c.bf16 %v5279_v50, %v5279_v50  ;;  %v3170_v52 = vrot.slane %v3169_v49, 4 }
 0x559   : > { %v3171_v53 = vrot.slane %v4208_v51, 7 }
 0x55b   : > { %v3172_v54 = vsel %vm5833_vm3, %v3170_v52, %v3171_v53  ;;  %v3173_v55 = vrot.slane %v3171_v53, 4 }
 0x55c   : > { %3178 = vst [vmem:[#allocation2 + $0x4] sm:$0xf] %v3172_v54 }
 0x55d   : > { %3179 = vst [vmem:[#allocation2 + $0x8] sm:$0x1] %v3173_v55 }
 0x55e   : > { %v3180_v56 = vld [vmem:[#allocation2] sm:$0xf] }
 0x55f   : > { %v3416_v11 = vld [vmem:[#allocation2] sm:$0xe] }
 0x560   : > { %v3662_v44 = vld [vmem:[#allocation2] sm:$0xc] }
 0x563   : > { %v6156_v57 = vld [vmem:[#allocation2 + $0x4] sm:$0xf] }
 0x564   : > { %v4148_v59 = vcombine.low %v3180_v56, %v6156_v57  ;;  %v6159_v60 = vld [vmem:[#allocation2 + $0x8] ss:$0 sps:$4 sm:$0x11]   ;;  %v4166_v12 = vcombine.low %v3416_v11, %v6156_v57  ;;  %v4184_v45 = vcombine.low %v3662_v44, %v6156_v57 }
 0x565   : > { %v3232_v62 = vshll.u32 %v6159_v60, 16  ;;  %v6174_v13 = vld [vmem:[#allocation2 + $0x8] ss:$0 sps:$4 sm:$0x33]   ;;  %v3438_v35 = vrot.slane %v6159_v60, 1 }
 0x566   : > { %4872 = vmatmul.mubr.bf16.vlgmr.msra.gmra.mxu1 %v4148_v59  ;;  %v3227_v61 = vshll.u32 %v4148_v59, 16  ;;  %v3225_v15 = vshrl.u32 %v4148_v59, 16  ;;  %v3554_v17 = vshrl.u32 %v4166_v12, 16  ;;  %v3557_v18 = vshll.u32 %v4166_v12, 16 }
 0x567   : > { %4896 = vmatpush3.bf16.msra.mxu1 %v5236_v58  ;;  %4911 = vmatprep.mubr.msk.bf16.mxu1 %vm5526_vm0, %v5524_v0  ;;  %v3234_v3 = vrot.slane %v3232_v62, 1  ;;  %v3562_v19 = vshrl.u32 %v6174_v13, 16  ;;  %v3565_v20 = vshll.u32 %v6174_v13, 16  ;;  %v3437_v34 = vrot.slane %v4166_v12, 1 }
 0x568   : > { %4897 = vmatprep.subr.bf16.mxu1 %v5524_v0  ;;  %v3229_v1 = vrot.slane %v3227_v61, 1  ;;  %v3556_v23 = vrot.slane %v3554_v17, 1  ;;  %v3559_v24 = vrot.slane %v3557_v18, 2  ;;  %v3683_v47 = vrot.slane %v4184_v45, 2 }
 0x569   : > { %v3564_v25 = vrot.slane %v3562_v19, 1  ;;  %v3567_v26 = vrot.slane %v3565_v20, 2  ;;  %v3439_v37 = vsel %vm894_vm6, %v3437_v34, %v3438_v35  ;;  %v3684_v48 = vrot.slane %v6174_v13, 2 }
 0x56a   : > { %v3230_v2 = vor.u32 %v3229_v1, %v3225_v15  ;;  %v3560_v29 = vor.u32 %v3559_v24, %v3556_v23 }
 0x56b   : > { %4898 = vmatpush3.bf16.msra.mxu1 %v5238_v63  ;;  %v3568_v30 = vor.u32 %v3567_v26, %v3564_v25  ;;  %v3685_v49 = vsel %vm1142_vm7, %v3683_v47, %v3684_v48 }
 0x56c   : > { %v3235_v6 = vsel %vm680_vm4, %v3230_v2, %v3234_v3  ;;  %4899 = vmatprep.subr.bf16.mxu1 %v5524_v0 }
 0x56d   : > { %4852 = vmatmul.mubr.bf16.vlgmr.msra.gmra.mxu0 %v3235_v6  ;;  %v3569_v32 = vsel %vm1011_vm5, %v3560_v29, %v3568_v30 }
 0x56e   : > { %4876 = vmatpush3.bf16.msra.mxu0 %v5240_v4  ;;  %4891 = vmatprep.mubr.msk.bf16.mxu0 %vm5526_vm0, %v5524_v0 }
 0x56f   : > { %4900 = vmatpush3.bf16.msra.mxu1 %v5241_v5  ;;  %4877 = vmatprep.subr.bf16.mxu0 %v5524_v0 }
 0x570   : > { %4901 = vmatprep.subr.bf16.mxu1 %v5524_v0 }
 0x572   : > { %4878 = vmatpush3.bf16.msra.mxu0 %v5242_v7  ;;  %v4193_v7 = vld [vmem:[%s6268_s10] ss:$0 sm:$0xff] }
 0x573   : > { %4902 = vmatpush3.bf16.msra.mxu1 %v5243_v8  ;;  %4879 = vmatprep.subr.bf16.mxu0 %v5524_v0 }
 0x574   : > { %4903 = vmatprep.subr.bf16.mxu1 %v5524_v0 }
 0x576   : > { %4880 = vmatpush3.bf16.msra.mxu0 %v5244_v9  ;;  %v4194_v9 = vld [vmem:[%s6322_s17] ss:$0 sm:$0xff] }
 0x577   : > { %4904 = vmatpush3.bf16.msra.mxu1 %v5245_v10  ;;  %4881 = vmatprep.subr.bf16.mxu0 %v5524_v0 }
 0x578   : > { %4905 = vmatprep.subr.bf16.mxu1 %v5524_v0 }
 0x57a   : > { %4882 = vmatpush3.bf16.msra.mxu0 %v5246_v14 }
 0x57b   : > { %4906 = vmatpush3.bf16.msra.mxu1 %v5247_v16  ;;  %4883 = vmatprep.subr.bf16.mxu0 %v5524_v0 }
 0x57c   : > { %4907 = vmatprep.subr.bf16.mxu1 %v5524_v0 }
 0x57e   : > { %4884 = vmatpush3.bf16.msra.mxu0 %v5248_v21 }
 0x57f   : > { %4908 = vmatpush3.bf16.msra.mxu1 %v5249_v22  ;;  %4885 = vmatprep.subr.bf16.mxu0 %v5524_v0 }
 0x580   : > { %4909 = vmatprep.subr.bf16.mxu1 %v5524_v0 }
 0x582   : > { %4886 = vmatpush3.bf16.msra.mxu0 %v5250_v27 }
 0x583   : > { %4910 = vmatpush3.bf16.msra.mxu1 %v5251_v28  ;;  %4887 = vmatprep.subr.bf16.mxu0 %v5524_v0 }
 0x586   : > { %4888 = vmatpush3.bf16.msra.mxu0 %v5252_v31  ;;  %4912 = vmatmul.mubr.bf16.vlgmr.msra.gmra.mxu1 %v3569_v32 }
 0x587   : > { %4889 = vmatprep.subr.bf16.mxu0 %v5524_v0 }
 0x58a   : > { %4890 = vmatpush3.bf16.msra.mxu0 %v5254_v33 }
 0x58b   : > { %4915 = vmatprep.subr.bf16.mxu0 %v5524_v0 }
 0x58d   : > { %4892 = vmatmul.mubr.bf16.vlgmr.msra.gmra.mxu0 %v3439_v37 }
 0x58e   : > { %4916 = vmatpush3.bf16.msra.mxu0 %v5255_v36  ;;  %4931 = vmatprep.mubr.msk.bf16.mxu0 %vm5526_vm0, %v5524_v0 }
 0x58f   : > { %4917 = vmatprep.subr.bf16.mxu0 %v5524_v0 }
 0x592   : > { %4918 = vmatpush3.bf16.msra.mxu0 %v5256_v38 }
 0x593   : > { %4919 = vmatprep.subr.bf16.mxu0 %v5524_v0 }
 0x596   : > { %4920 = vmatpush3.bf16.msra.mxu0 %v5257_v39 }
 0x597   : > { %4921 = vmatprep.subr.bf16.mxu0 %v5524_v0 }
 0x59a   : > { %4922 = vmatpush3.bf16.msra.mxu0 %v5258_v40 }
 0x59b   : > { %4923 = vmatprep.subr.bf16.mxu0 %v5524_v0 }
 0x59e   : > { %4924 = vmatpush3.bf16.msra.mxu0 %v5259_v41 }
 0x59f   : > { %4925 = vmatprep.subr.bf16.mxu0 %v5524_v0 }
 0x5a2   : > { %4926 = vmatpush3.bf16.msra.mxu0 %v5260_v42 }
 0x5a3   : > { %4927 = vmatprep.subr.bf16.mxu0 %v5524_v0 }
 0x5a6   : > { %4928 = vmatpush3.bf16.msra.mxu0 %v5261_v43 }
 0x5a7   : > { %4929 = vmatprep.subr.bf16.mxu0 %v5524_v0 }
 0x5aa   : > { %4930 = vmatpush3.bf16.msra.mxu0 %v5262_v46 }
 0x5ad   : > { %4932 = vmatmul.mubr.bf16.vlgmr.msra.gmra.mxu0 %v3685_v49 }
 0x626   : > { %v3409_v50 = vpop.f32.mrf.mxu1 }
 0x628   : > { %v4873_v51 = vpop.f32.mrf.mxu1 }
 0x62a   : > { %v3412_v52 = vpop.f32.mrf.mxu1 }
 0x62c   : > { %v4874_v53 = vpop.f32.mrf.mxu1 }
 0x62d   : > { %v3319_v54 = vpop.f32.mrf.mxu0 }
 0x62e   : > { %v3410_v1 = vadd.f32 %v3409_v50, %v3319_v54 }
 0x62f   : > { %v4853_v55 = vpop.f32.mrf.mxu0 }
 0x631   : > { %v3322_v56 = vpop.f32.mrf.mxu0 }
 0x632   : > { %v3413_v3 = vadd.f32 %v3412_v52, %v3322_v56 }
 0x633   : > { %v4854_v57 = vpop.f32.mrf.mxu0 }
 0x646   : > { %v3653_v58 = vpop.f32.mrf.mxu1 }
 0x648   : > { %v4913_v59 = vpop.f32.mrf.mxu1 }
 0x64a   : > { %v3656_v60 = vpop.f32.mrf.mxu1 }
 0x64c   : > { %v4914_v0 = vpop.f32.mrf.mxu1 }
 0x64d   : > { %v3523_v61 = vpop.f32.mrf.mxu0 }
 0x64e   : > { %v3530_v2 = vadd.f32 %v3523_v61, %v3410_v1 }
 0x64f   : > { %v4893_v62 = vpop.f32.mrf.mxu0 }
 0x650   : > { %v3660_v5 = vadd.f32 %v3653_v58, %v3530_v2 }
 0x651   : > { %v3526_v63 = vpop.f32.mrf.mxu0 }
 0x652   : > { %v3531_v4 = vadd.f32 %v3526_v63, %v3413_v3 }
 0x653   : > { %v4894_v15 = vpop.f32.mrf.mxu0 }
 0x654   : > { %v3661_v12 = vadd.f32 %v3656_v60, %v3531_v4 }
 0x66d   : > { %v3769_v6 = vpop.f32.mrf.mxu0 }
 0x66e   : > { %v3776_v8 = vadd.f32 %v3769_v6, %v3660_v5 }
 0x66f   : > { %v4933_v10 = vpop.f32.mrf.mxu0 }
 0x670   : > { %v3785_v11 = vmul.f32 %v4193_v7, %v3776_v8 }
 0x671   : > { %v3772_v13 = vpop.f32.mrf.mxu0 }
 0x672   : > { %v3794_v14 = vadd.f32 %v4194_v9, %v3785_v11  ;;  %v3777_v16 = vadd.f32 %v3772_v13, %v3661_v12 }
 0x673   : > { %v4934_v17 = vpop.f32.mrf.mxu0 }
 0x674   : > { %3796 = vst [vmem:[%s612_s25] sm:$0xff] %v3794_v14  ;;  %v3786_v18 = vmul.f32 %v4193_v7, %v3777_v16 }
 0x676   : > { %v3795_v19 = vadd.f32 %v4194_v9, %v3786_v18 }
 0x678   : > { %3797 = vst [vmem:[%s612_s25 + $0x8] sm:$0xff] %v3795_v19 }
 0x679   : > { %5451 = shalt.err (!%p5448_p3)
}
 0x67a   : > { %s5452_s0 = scalar_lea.hbm %s6215_s2, 256  ;;  %s5456_s25 = scalar_lea.hbm %s6323_s3, 512 }
 0x67b   : > { %p5453_p4 = scmp.ne.s32.totalorder %s6215_s2, %s5452_s0  ;;  %p5457_p2 = scmp.lt.s32.totalorder %s6215_s2, %s6323_s3 }
 0x67c   : > { %p5458_p7 = scmp.lt.s32.totalorder %s5456_s25, %s5452_s0 }
 0x67d   : > { %p5454_p12 = pnand %p5453_p4, %p6324_p11 }
 0x67e   : > { %p5459_p8 = por %p5458_p7, %p5457_p2 }
 0x67f   : > { %p5455_p6 = pneg %p5454_p12 }
 0x681   : > { %p5460_p10 = pnand %p5459_p8, %p5455_p6 }
 0x683   : > { %5463 = shalt.err (!%p5460_p10)
}
 0x684   : > { %s5528_s16 = smov 128   ;;  %s5529_s5 = smov 8  }
 0x685   : > { %4957 = dma.vmem_to_hbm [thread:$0]  (%p6324_p11), %s6210_s18, 256, %s6215_s2, %s3799_s4, %s5528_s16, %s5528_s16, %s5529_s5  }
 0x686 PF: > { %s3827_s27 = sand.u32 1, %s5502_s21   ;;  %p6325_p0 = scmp.ne.s32.totalorder %s6307_s30, 0 }
 0x687   : > { %p6326_p13 = scmp.ge.s32.totalorder %s5514_s24, 2  ;;  %s3828_s28 = scalar_lea.sflag [#allocation6], %s3827_s27 }
 0x689   : > { %p4980_p5 = pnand %p6326_p13, %p6325_p0 }
 0x68b   : > { %p4981_p9 = pneg %p4980_p5 }
 0x68d   : > { %5497 = dma.done.wait (%p4981_p9), %s3828_s28, 256  }
 0x68e   : > { %5499 = vsyncadd (%p4981_p9), %s3828_s28, 4294967040  ;;  %s6327_s24 = sld [smem:[#allocation22_spill]]  ;;  %s6330_s21 = smov %s5506_s22 }
 0x68f   : > { %s6328_s15 = sld [smem:[#allocation21_spill]] }
 0x690   : > { %s6329_s23 = sld [smem:[#allocation23_spill]] }
 0x694   : > { %p32_p1 = scmp.ge.s32.totalorder %s6327_s24, 4  }
 0x695   : > { %s6331_s22 = smov %s6328_s15 }
 0x696   :  { %34 = sbr.rel (!%p32_p1) target bundleno = 17 (0x11), region = 169 }
 0x69b   :  { %3833 = vsyncpa [#allocation5], 1 }
 0x69c   :  { %3835 = vsyncpa [#allocation5 + $0x1], 1 }
 0x69d   :  { %3836 = vsyncpa [#allocation8], 1 }
 0x69e   :  { %3837 = vsyncpa [#allocation11], 1 }
 0x69f   :  { %3838 = vsyncpa [#allocation14], 1 }
 0x6a0   :  { %3839 = vsyncpa [#allocation6], 1 }
 0x6a1   :  { %3841 = vsyncpa [#allocation6 + $0x1], 1 }

</bundles_post_ra>
